<compile_context>
chip_gen: v5e
topology: v5e:2x2
jax: 0.10.0
libtpu: 0.0.40
codegen_flags: <defaults>
</compile_context>

<pallas_src>
import functools

import jax
import jax.numpy as jnp
from jax import lax
from jax.experimental import pallas as pl
from jax.experimental.pallas import tpu as pltpu

EPS = 1e-5
LANES = 128


def _round_up(x, m):
    return (x + m - 1) // m * m


def _pick_tile_m(m, target=512):
    """Largest multiple of 8 that divides m and is <= target (else m itself)."""
    if m % 8 != 0:
        return m
    t = min(m, target)
    t -= t % 8
    while m % t != 0:
        t -= 8
    return t


# ----------------------------- Pallas kernels ------------------------------ #

def _conv_stats_kernel(*refs, n_srcs, taps, out_hw, sc_tap):
    """One image: 3x3 conv as shifted-tap bf16 matmuls + per-channel sum/sumsq.

    Optionally also computes the 1x1 projection-shortcut conv from the same
    resident input window (sc_tap = (src_idx, row_off, col_off)).
    """
    ho, wo = out_hw
    m = ho * wo
    has_sc = sc_tap is not None
    srcs = refs[:n_srcs]
    w_ref = refs[n_srcs]                              # (n_taps, Cin_p, Cout_p) bf16
    n_in = n_srcs + 1 + (1 if has_sc else 0)
    y_ref, st_ref = refs[n_in], refs[n_in + 1]

    cin = srcs[0].shape[-1]
    cout = w_ref.shape[-1]

    acc = jnp.zeros((m, cout), jnp.float32)
    for k, (si, dy, dx) in enumerate(taps):
        xs = srcs[si][0, dy:dy + ho, dx:dx + wo, :]   # (ho, wo, cin) bf16
        acc = acc + jnp.dot(xs.reshape(m, cin), w_ref[k],
                            preferred_element_type=jnp.float32)
    y_ref[0] = acc.reshape(ho, wo, cout)
    st_ref[0, 0:1, :] = jnp.sum(acc, axis=0, keepdims=True)
    st_ref[0, 1:2, :] = jnp.sum(acc * acc, axis=0, keepdims=True)

    if has_sc:
        wsc_ref = refs[n_srcs + 1]                    # (Cin_p, Cout_p) bf16
        ysc_ref, stsc_ref = refs[n_in + 2], refs[n_in + 3]
        si, dy, dx = sc_tap
        xs = srcs[si][0, dy:dy + ho, dx:dx + wo, :]
        ysc = jnp.dot(xs.reshape(m, cin), wsc_ref[...],
                      preferred_element_type=jnp.float32)
        ysc_ref[0] = ysc.reshape(ho, wo, cout)
        stsc_ref[0, 0:1, :] = jnp.sum(ysc, axis=0, keepdims=True)
        stsc_ref[0, 1:2, :] = jnp.sum(ysc * ysc, axis=0, keepdims=True)


def _bn_relu_conv_stats_kernel(y1_ref, sc_ref, sh_ref, w_ref, y2_ref, st_ref,
                               pad_scr, *, out_hw):
    """One image: a1 = relu(y1*scale1 + shift1)  (bn1 fused on the fly), then a
    3x3/stride-1 conv of a1 using an in-VMEM zero-padded scratch, plus stats."""
    ho, wo = out_hw
    m = ho * wo
    cp = w_ref.shape[-1]

    a1 = jnp.maximum(y1_ref[0] * sc_ref[...] + sh_ref[...], 0.0)   # (ho, wo, cp) f32
    pad_scr[...] = jnp.zeros_like(pad_scr)       # zero every step: safe under
    pad_scr[1:ho + 1, 1:wo + 1, :] = a1          # megacore "parallel" scheduling

    acc = jnp.zeros((m, cp), jnp.float32)
    for k in range(9):
        dy, dx = k // 3, k % 3
        xs = pad_scr[dy:dy + ho, dx:dx + wo, :].astype(jnp.bfloat16)
        acc = acc + jnp.dot(xs.reshape(m, cp), w_ref[k],
                            preferred_element_type=jnp.float32)
    y2_ref[0] = acc.reshape(ho, wo, cp)
    st_ref[0, 0:1, :] = jnp.sum(acc, axis=0, keepdims=True)
    st_ref[0, 1:2, :] = jnp.sum(acc * acc, axis=0, keepdims=True)


def _finalize_kernel(y2_ref, sc_ref, s2_ref, h2_ref, ssc_ref, hsc_ref, o_ref):
    """out = relu(bn2(y2) + bn_sc(shortcut)); BN folded into scale/shift."""
    out = (y2_ref[...] * s2_ref[...] + h2_ref[...]
           + sc_ref[...] * ssc_ref[...] + hsc_ref[...])
    o_ref[...] = jnp.maximum(out, 0.0)


# ------------------------------ pallas_call glue ---------------------------- #

_PAR = pltpu.CompilerParams(dimension_semantics=("parallel",))


def _conv_bn_stats_call(srcs, w, wsc, out_hw, taps, sc_tap):
    n = srcs[0].shape[0]
    ho, wo = out_hw
    cout = w.shape[-1]

    in_specs = [pl.BlockSpec((1,) + tuple(s.shape[1:]),
                             lambda i: (i, 0, 0, 0)) for s in srcs]
    in_specs.append(pl.BlockSpec(tuple(w.shape), lambda i: (0, 0, 0)))
    args = list(srcs) + [w]

    out_shape = [jax.ShapeDtypeStruct((n, ho, wo, cout), jnp.float32),
                 jax.ShapeDtypeStruct((n, 2, cout), jnp.float32)]
    out_specs = [pl.BlockSpec((1, ho, wo, cout), lambda i: (i, 0, 0, 0)),
                 pl.BlockSpec((1, 2, cout), lambda i: (i, 0, 0))]
    if sc_tap is not None:
        in_specs.append(pl.BlockSpec(tuple(wsc.shape), lambda i: (0, 0)))
        args.append(wsc)
        out_shape += [jax.ShapeDtypeStruct((n, ho, wo, cout), jnp.float32),
                      jax.ShapeDtypeStruct((n, 2, cout), jnp.float32)]
        out_specs += [pl.BlockSpec((1, ho, wo, cout), lambda i: (i, 0, 0, 0)),
                      pl.BlockSpec((1, 2, cout), lambda i: (i, 0, 0))]

    kernel = functools.partial(_conv_stats_kernel, n_srcs=len(srcs), taps=taps,
                               out_hw=out_hw, sc_tap=sc_tap)
    return pl.pallas_call(
        kernel,
        grid=(n,),
        in_specs=in_specs,
        out_specs=tuple(out_specs),
        out_shape=tuple(out_shape),
        compiler_params=_PAR,
    )(*args)


def _bn_relu_conv_call(y1, scale1, shift1, w2, out_hw):
    n, ho, wo, cp = y1.shape
    kernel = functools.partial(_bn_relu_conv_stats_kernel, out_hw=out_hw)
    return pl.pallas_call(
        kernel,
        grid=(n,),
        in_specs=[pl.BlockSpec((1, ho, wo, cp), lambda i: (i, 0, 0, 0)),
                  pl.BlockSpec((1, cp), lambda i: (0, 0)),
                  pl.BlockSpec((1, cp), lambda i: (0, 0)),
                  pl.BlockSpec(tuple(w2.shape), lambda i: (0, 0, 0))],
        out_specs=(pl.BlockSpec((1, ho, wo, cp), lambda i: (i, 0, 0, 0)),
                   pl.BlockSpec((1, 2, cp), lambda i: (i, 0, 0))),
        out_shape=(jax.ShapeDtypeStruct((n, ho, wo, cp), jnp.float32),
                   jax.ShapeDtypeStruct((n, 2, cp), jnp.float32)),
        scratch_shapes=[pltpu.VMEM((ho + 2, wo + 2, cp), jnp.float32)],
        compiler_params=_PAR,
    )(y1, scale1, shift1, w2)


def _finalize_call(y2_flat, sc_flat, scale2, shift2, scale_sc, shift_sc):
    m, cp = y2_flat.shape
    tm = _pick_tile_m(m)
    vec = pl.BlockSpec((1, cp), lambda i: (0, 0))
    return pl.pallas_call(
        _finalize_kernel,
        grid=(m // tm,),
        in_specs=[pl.BlockSpec((tm, cp), lambda i: (i, 0)),
                  pl.BlockSpec((tm, cp), lambda i: (i, 0)),
                  vec, vec, vec, vec],
        out_specs=pl.BlockSpec((tm, cp), lambda i: (i, 0)),
        out_shape=jax.ShapeDtypeStruct((m, cp), jnp.float32),
        compiler_params=_PAR,
    )(y2_flat, sc_flat, scale2, shift2, scale_sc, shift_sc)


def _scale_shift(stats, gamma, beta, m_total):
    """stats: (tiles, 2, Cp) per-tile [sum, sumsq] -> BN (scale, shift), (1, Cp)."""
    s = jnp.sum(stats[:, 0, :], axis=0)
    q = jnp.sum(stats[:, 1, :], axis=0)
    mean = s / m_total
    var = jnp.maximum(q / m_total - mean * mean, 0.0)   # biased, training-mode
    scale = gamma * lax.rsqrt(var + EPS)
    shift = beta - mean * scale
    return scale[None, :], shift[None, :]


# --------------------------------- module ----------------------------------- #

class BasicBlockPallas:
    expansion = 1

    def __init__(self, key, in_planes, planes, stride=1):
        assert stride in (1, 2), "BasicBlock only uses stride 1 or 2"
        self.in_planes, self.planes, self.stride = in_planes, planes, stride
        ks = jax.random.split(key, 9)
        # PyTorch-layout parameters (kept in f32 for the reference).
        self.w1 = 0.1 * jax.random.normal(ks[0], (planes, in_planes, 3, 3), jnp.float32)
        self.w2 = 0.1 * jax.random.normal(ks[1], (planes, planes, 3, 3), jnp.float32)
        self.g1 = 1.0 + 0.1 * jax.random.normal(ks[2], (planes,), jnp.float32)
        self.b1 = 0.1 * jax.random.normal(ks[3], (planes,), jnp.float32)
        self.g2 = 1.0 + 0.1 * jax.random.normal(ks[4], (planes,), jnp.float32)
        self.b2 = 0.1 * jax.random.normal(ks[5], (planes,), jnp.float32)
        self.has_proj = (stride != 1) or (in_planes != self.expansion * planes)
        if self.has_proj:
            self.wsc = 0.1 * jax.random.normal(
                ks[6], (self.expansion * planes, in_planes, 1, 1), jnp.float32)
            self.gsc = 1.0 + 0.1 * jax.random.normal(ks[7], (planes,), jnp.float32)
            self.bsc = 0.1 * jax.random.normal(ks[8], (planes,), jnp.float32)

        # One-time TPU-friendly repack: channels padded to 128 lanes, bf16 weights.
        self.cin_p = _round_up(in_planes, LANES)
        self.cp = _round_up(self.expansion * planes, LANES)
        self.w1_k = self._pack_w3x3(self.w1, self.cin_p, self.cp)
        self.w2_k = self._pack_w3x3(self.w2, self.cp, self.cp)
        self.g1_p = self._pad_vec(self.g1, self.cp)
        self.b1_p = self._pad_vec(self.b1, self.cp)
        self.g2_p = self._pad_vec(self.g2, self.cp)
        self.b2_p = self._pad_vec(self.b2, self.cp)
        if self.has_proj:
            wsc = jnp.transpose(self.wsc[:, :, 0, 0], (1, 0))       # (cin, cout)
            self.wsc_k = (jnp.zeros((self.cin_p, self.cp), jnp.float32)
                          .at[:in_planes, :planes].set(wsc).astype(jnp.bfloat16))
            self.gsc_p = self._pad_vec(self.gsc, self.cp)
            self.bsc_p = self._pad_vec(self.bsc, self.cp)
        else:
            self.wsc_k = None

    @staticmethod
    def _pack_w3x3(w_oihw, cin_p, cout_p):
        cout, cin = w_oihw.shape[0], w_oihw.shape[1]
        w = jnp.transpose(w_oihw, (2, 3, 1, 0)).reshape(9, cin, cout)
        w = jnp.zeros((9, cin_p, cout_p), jnp.float32).at[:, :cin, :cout].set(w)
        return w.astype(jnp.bfloat16)

    @staticmethod
    def _pad_vec(v, cp):
        return jnp.zeros((cp,), jnp.float32).at[:v.shape[0]].set(v)

    def __call__(self, x_nchw):
        n, cin, h, w = x_nchw.shape
        s = self.stride
        cp, cin_p = self.cp, self.cin_p
        ho = (h - 1) // s + 1
        wo = (w - 1) // s + 1
        m_total = float(n * ho * wo)

        # NCHW -> NHWC, channels zero-padded to a lane multiple (done once).
        x = jnp.transpose(x_nchw, (0, 2, 3, 1)).astype(jnp.float32)
        x = jnp.pad(x, ((0, 0), (0, 0), (0, 0), (0, cin_p - cin)))
        xb = x.astype(jnp.bfloat16)

        # Spatial zero padding for the 3x3 conv (padded extents even when s=2).
        hp = _round_up(h + 2, s)
        wp = _round_up(w + 2, s)
        xp = jnp.pad(xb, ((0, 0), (1, hp - h - 1), (1, wp - w - 1), (0, 0)))

        if s == 1:
            srcs = [xp]
            taps = [(0, dy, dx) for dy in range(3) for dx in range(3)]
            sc_tap = (0, 1, 1) if self.has_proj else None
        else:
            # stride 2: 4 spatial phase views -> every in-kernel tap is a plain
            # contiguous static slice; total bytes == padded input (no blow-up).
            srcs = [xp[:, py::2, px::2, :] for py in range(2) for px in range(2)]
            taps = [((dy % 2) * 2 + (dx % 2), dy // 2, dx // 2)
                    for dy in range(3) for dx in range(3)]
            sc_tap = (3, 0, 0) if self.has_proj else None   # x[2i,2j] == phase(1,1)

        # conv1 (+ projection-shortcut conv) + per-image BN partial stats.
        outs = _conv_bn_stats_call(srcs, self.w1_k, self.wsc_k, (ho, wo), taps, sc_tap)
        if self.has_proj:
            y1, st1, ysc, stsc = outs
        else:
            y1, st1 = outs
        scale1, shift1 = _scale_shift(st1, self.g1_p, self.b1_p, m_total)

        # bn1 + ReLU fused into conv2's input stage; conv2 + its partial stats.
        y2, st2 = _bn_relu_conv_call(y1, scale1, shift1, self.w2_k, (ho, wo))
        scale2, shift2 = _scale_shift(st2, self.g2_p, self.b2_p, m_total)

        # Shortcut branch expressed as scale/shift on a raw tensor.
        if self.has_proj:
            scale_sc, shift_sc = _scale_shift(stsc, self.gsc_p, self.bsc_p, m_total)
            sc_flat = ysc.reshape(n * ho * wo, cp)
        else:
            scale_sc = jnp.ones((1, cp), jnp.float32)
            shift_sc = jnp.zeros((1, cp), jnp.float32)
            sc_flat = x.reshape(n * ho * wo, cp)

        # bn2 + bn_sc + residual add + ReLU over lane-dense M tiles.
        out = _finalize_call(y2.reshape(n * ho * wo, cp), sc_flat,
                             scale2, shift2, scale_sc, shift_sc)
        out = out.reshape(n, ho, wo, cp)[:, :, :, :self.planes]
        return jnp.transpose(out, (0, 3, 1, 2))      # back to NCHW


# --------------------------- pure-JAX reference ----------------------------- #

def _ref_conv(x, w, stride, pad):
    # Match the kernels' numerics: bf16 MXU operands, f32 accumulation.
    return lax.conv_general_dilated(
        x.astype(jnp.bfloat16), w.astype(jnp.bfloat16),
        (stride, stride), [(pad, pad), (pad, pad)],
        dimension_numbers=("NCHW", "OIHW", "NCHW"),
        preferred_element_type=jnp.float32)


def _ref_bn(y, g, b):
    m = jnp.mean(y, axis=(0, 2, 3), keepdims=True)
    v = jnp.mean(jnp.square(y - m), axis=(0, 2, 3), keepdims=True)
    return (y - m) * lax.rsqrt(v + EPS) * g[None, :, None, None] + b[None, :, None, None]


def reference(blk, x):
    out = jax.nn.relu(_ref_bn(_ref_conv(x, blk.w1, blk.stride, 1), blk.g1, blk.b1))
    out = _ref_bn(_ref_conv(out, blk.w2, 1, 1), blk.g2, blk.b2)
    if blk.has_proj:
        sc = _ref_bn(_ref_conv(x, blk.wsc, blk.stride, 0), blk.gsc, blk.bsc)
    else:
        sc = x
    return jax.nn.relu(out + sc)


# ----------------------------------- main ----------------------------------- #

if __name__ == "__main__":
    key = jax.random.PRNGKey(0)
    kx, kb1, kb2 = jax.random.split(key, 3)
    x = jax.random.normal(kx, (2, 4, 16, 16), jnp.float32)  # NCHW, like PyTorch

    # Case 1: projection shortcut (stride=2, channel change 4 -> 8)
    blk1 = BasicBlockPallas(kb1, in_planes=4, planes=8, stride=2)
    y1 = jax.block_until_ready(blk1(x))
    r1 = jax.block_until_ready(reference(blk1, x))
    assert y1.shape == (2, 8, 8, 8), y1.shape
    assert jnp.allclose(y1, r1, atol=1e-2, rtol=1e-2), float(jnp.max(jnp.abs(y1 - r1)))
    assert float(jnp.mean(jnp.abs(y1 - r1))) < 1.5e-3

    # Case 2: identity shortcut (stride=1, 4 -> 4)
    blk2 = BasicBlockPallas(kb2, in_planes=4, planes=4, stride=1)
    y2 = jax.block_until_ready(blk2(x))
    r2 = jax.block_until_ready(reference(blk2, x))
    assert y2.shape == (2, 4, 16, 16), y2.shape
    assert jnp.allclose(y2, r2, atol=1e-2, rtol=1e-2), float(jnp.max(jnp.abs(y2 - r2)))
    assert float(jnp.mean(jnp.abs(y2 - r2))) < 1.5e-3

    print("KERNEL_OK")
</pallas_src>

<mosaic_0001>
module attributes {stable_mosaic.version = 11 : i64} {
  func.func @_conv_stats_kernel(%arg0: i32, %arg1: memref<1x9x9x128xbf16, #tpu.memory_space<vmem>>, %arg2: memref<1x9x9x128xbf16, #tpu.memory_space<vmem>>, %arg3: memref<1x9x9x128xbf16, #tpu.memory_space<vmem>>, %arg4: memref<1x9x9x128xbf16, #tpu.memory_space<vmem>>, %arg5: memref<9x128x128xbf16, #tpu.memory_space<vmem>>, %arg6: memref<128x128xbf16, #tpu.memory_space<vmem>>, %arg7: memref<1x8x8x128xf32, #tpu.memory_space<vmem>>, %arg8: memref<1x2x128xf32, #tpu.memory_space<vmem>>, %arg9: memref<1x8x8x128xf32, #tpu.memory_space<vmem>>, %arg10: memref<1x2x128xf32, #tpu.memory_space<vmem>>) attributes {dimension_semantics = [#tpu.dimension_semantics<parallel>], iteration_bounds = array<i64: 2>, scalar_prefetch = 0 : i64, scratch_operands = 0 : i64, tpu.core_type = #tpu.core_type<tc>, window_params = [{transform_indices = @transform_0, window_bounds = array<i64: 1, 9, 9, 128>}, {transform_indices = @transform_1, window_bounds = array<i64: 1, 9, 9, 128>}, {transform_indices = @transform_2, window_bounds = array<i64: 1, 9, 9, 128>}, {transform_indices = @transform_3, window_bounds = array<i64: 1, 9, 9, 128>}, {pipeline_mode = #tpu.pipeline_mode<synchronous>, transform_indices = @transform_4, window_bounds = array<i64: 9, 128, 128>}, {pipeline_mode = #tpu.pipeline_mode<synchronous>, transform_indices = @transform_5, window_bounds = array<i64: 128, 128>}, {transform_indices = @transform_6, window_bounds = array<i64: 1, 8, 8, 128>}, {transform_indices = @transform_7, window_bounds = array<i64: 1, 2, 128>}, {transform_indices = @transform_8, window_bounds = array<i64: 1, 8, 8, 128>}, {transform_indices = @transform_9, window_bounds = array<i64: 1, 2, 128>}]} {
    %cst = arith.constant 0.000000e+00 : f32
    %0 = vector.broadcast %cst : f32 to vector<64x128xf32>
    %c0 = arith.constant 0 : index
    %c0_0 = arith.constant 0 : index
    %c0_1 = arith.constant 0 : index
    %c0_2 = arith.constant 0 : index
    %1 = vector.load %arg1[%c0, %c0_0, %c0_1, %c0_2] : memref<1x9x9x128xbf16, #tpu.memory_space<vmem>>, vector<1x8x8x128xbf16>
    %2 = vector.shape_cast %1 : vector<1x8x8x128xbf16> to vector<8x8x128xbf16>
    %3 = vector.shape_cast %2 : vector<8x8x128xbf16> to vector<64x128xbf16>
    %c0_3 = arith.constant 0 : index
    %c0_4 = arith.constant 0 : index
    %c0_5 = arith.constant 0 : index
    %4 = vector.load %arg5[%c0_3, %c0_4, %c0_5] : memref<9x128x128xbf16, #tpu.memory_space<vmem>>, vector<1x128x128xbf16>
    %5 = vector.shape_cast %4 : vector<1x128x128xbf16> to vector<128x128xbf16>
    %cst_6 = arith.constant dense<0.000000e+00> : vector<64x128xf32>
    %6 = tpu.matmul %3, %5, %cst_6 {dimension_numbers = #tpu.dot_dimension_numbers<[1], [0], [0], [1], [0, 0, 1, 1], [], []>} : vector<64x128xbf16>, vector<128x128xbf16>, vector<64x128xf32> -> vector<64x128xf32>
    %7 = arith.addf %0, %6 : vector<64x128xf32>
    %c0_7 = arith.constant 0 : index
    %c0_8 = arith.constant 0 : index
    %c0_9 = arith.constant 0 : index
    %c0_10 = arith.constant 0 : index
    %8 = vector.load %arg2[%c0_7, %c0_8, %c0_9, %c0_10] : memref<1x9x9x128xbf16, #tpu.memory_space<vmem>>, vector<1x8x8x128xbf16>
    %9 = vector.shape_cast %8 : vector<1x8x8x128xbf16> to vector<8x8x128xbf16>
    %10 = vector.shape_cast %9 : vector<8x8x128xbf16> to vector<64x128xbf16>
    %c1 = arith.constant 1 : index
    %c0_11 = arith.constant 0 : index
    %c0_12 = arith.constant 0 : index
    %11 = vector.load %arg5[%c1, %c0_11, %c0_12] : memref<9x128x128xbf16, #tpu.memory_space<vmem>>, vector<1x128x128xbf16>
    %12 = vector.shape_cast %11 : vector<1x128x128xbf16> to vector<128x128xbf16>
    %cst_13 = arith.constant dense<0.000000e+00> : vector<64x128xf32>
    %13 = tpu.matmul %10, %12, %cst_13 {dimension_numbers = #tpu.dot_dimension_numbers<[1], [0], [0], [1], [0, 0, 1, 1], [], []>} : vector<64x128xbf16>, vector<128x128xbf16>, vector<64x128xf32> -> vector<64x128xf32>
    %14 = arith.addf %7, %13 : vector<64x128xf32>
    %c0_14 = arith.constant 0 : index
    %c0_15 = arith.constant 0 : index
    %c1_16 = arith.constant 1 : index
    %c0_17 = arith.constant 0 : index
    %15 = vector.load %arg1[%c0_14, %c0_15, %c1_16, %c0_17] : memref<1x9x9x128xbf16, #tpu.memory_space<vmem>>, vector<1x8x8x128xbf16>
    %16 = vector.shape_cast %15 : vector<1x8x8x128xbf16> to vector<8x8x128xbf16>
    %17 = vector.shape_cast %16 : vector<8x8x128xbf16> to vector<64x128xbf16>
    %c2 = arith.constant 2 : index
    %c0_18 = arith.constant 0 : index
    %c0_19 = arith.constant 0 : index
    %18 = vector.load %arg5[%c2, %c0_18, %c0_19] : memref<9x128x128xbf16, #tpu.memory_space<vmem>>, vector<1x128x128xbf16>
    %19 = vector.shape_cast %18 : vector<1x128x128xbf16> to vector<128x128xbf16>
    %cst_20 = arith.constant dense<0.000000e+00> : vector<64x128xf32>
    %20 = tpu.matmul %17, %19, %cst_20 {dimension_numbers = #tpu.dot_dimension_numbers<[1], [0], [0], [1], [0, 0, 1, 1], [], []>} : vector<64x128xbf16>, vector<128x128xbf16>, vector<64x128xf32> -> vector<64x128xf32>
    %21 = arith.addf %14, %20 : vector<64x128xf32>
    %c0_21 = arith.constant 0 : index
    %c0_22 = arith.constant 0 : index
    %c0_23 = arith.constant 0 : index
    %c0_24 = arith.constant 0 : index
    %22 = vector.load %arg3[%c0_21, %c0_22, %c0_23, %c0_24] : memref<1x9x9x128xbf16, #tpu.memory_space<vmem>>, vector<1x8x8x128xbf16>
    %23 = vector.shape_cast %22 : vector<1x8x8x128xbf16> to vector<8x8x128xbf16>
    %24 = vector.shape_cast %23 : vector<8x8x128xbf16> to vector<64x128xbf16>
    %c3 = arith.constant 3 : index
    %c0_25 = arith.constant 0 : index
    %c0_26 = arith.constant 0 : index
    %25 = vector.load %arg5[%c3, %c0_25, %c0_26] : memref<9x128x128xbf16, #tpu.memory_space<vmem>>, vector<1x128x128xbf16>
    %26 = vector.shape_cast %25 : vector<1x128x128xbf16> to vector<128x128xbf16>
    %cst_27 = arith.constant dense<0.000000e+00> : vector<64x128xf32>
    %27 = tpu.matmul %24, %26, %cst_27 {dimension_numbers = #tpu.dot_dimension_numbers<[1], [0], [0], [1], [0, 0, 1, 1], [], []>} : vector<64x128xbf16>, vector<128x128xbf16>, vector<64x128xf32> -> vector<64x128xf32>
    %28 = arith.addf %21, %27 : vector<64x128xf32>
    %c0_28 = arith.constant 0 : index
    %c0_29 = arith.constant 0 : index
    %c0_30 = arith.constant 0 : index
    %c0_31 = arith.constant 0 : index
    %29 = vector.load %arg4[%c0_28, %c0_29, %c0_30, %c0_31] : memref<1x9x9x128xbf16, #tpu.memory_space<vmem>>, vector<1x8x8x128xbf16>
    %30 = vector.shape_cast %29 : vector<1x8x8x128xbf16> to vector<8x8x128xbf16>
    %31 = vector.shape_cast %30 : vector<8x8x128xbf16> to vector<64x128xbf16>
    %c4 = arith.constant 4 : index
    %c0_32 = arith.constant 0 : index
    %c0_33 = arith.constant 0 : index
    %32 = vector.load %arg5[%c4, %c0_32, %c0_33] : memref<9x128x128xbf16, #tpu.memory_space<vmem>>, vector<1x128x128xbf16>
    %33 = vector.shape_cast %32 : vector<1x128x128xbf16> to vector<128x128xbf16>
    %cst_34 = arith.constant dense<0.000000e+00> : vector<64x128xf32>
    %34 = tpu.matmul %31, %33, %cst_34 {dimension_numbers = #tpu.dot_dimension_numbers<[1], [0], [0], [1], [0, 0, 1, 1], [], []>} : vector<64x128xbf16>, vector<128x128xbf16>, vector<64x128xf32> -> vector<64x128xf32>
    %35 = arith.addf %28, %34 : vector<64x128xf32>
    %c0_35 = arith.constant 0 : index
    %c0_36 = arith.constant 0 : index
    %c1_37 = arith.constant 1 : index
    %c0_38 = arith.constant 0 : index
    %36 = vector.load %arg3[%c0_35, %c0_36, %c1_37, %c0_38] : memref<1x9x9x128xbf16, #tpu.memory_space<vmem>>, vector<1x8x8x128xbf16>
    %37 = vector.shape_cast %36 : vector<1x8x8x128xbf16> to vector<8x8x128xbf16>
    %38 = vector.shape_cast %37 : vector<8x8x128xbf16> to vector<64x128xbf16>
    %c5 = arith.constant 5 : index
    %c0_39 = arith.constant 0 : index
    %c0_40 = arith.constant 0 : index
    %39 = vector.load %arg5[%c5, %c0_39, %c0_40] : memref<9x128x128xbf16, #tpu.memory_space<vmem>>, vector<1x128x128xbf16>
    %40 = vector.shape_cast %39 : vector<1x128x128xbf16> to vector<128x128xbf16>
    %cst_41 = arith.constant dense<0.000000e+00> : vector<64x128xf32>
    %41 = tpu.matmul %38, %40, %cst_41 {dimension_numbers = #tpu.dot_dimension_numbers<[1], [0], [0], [1], [0, 0, 1, 1], [], []>} : vector<64x128xbf16>, vector<128x128xbf16>, vector<64x128xf32> -> vector<64x128xf32>
    %42 = arith.addf %35, %41 : vector<64x128xf32>
    %c0_42 = arith.constant 0 : index
    %c1_43 = arith.constant 1 : index
    %c0_44 = arith.constant 0 : index
    %c0_45 = arith.constant 0 : index
    %43 = vector.load %arg1[%c0_42, %c1_43, %c0_44, %c0_45] : memref<1x9x9x128xbf16, #tpu.memory_space<vmem>>, vector<1x8x8x128xbf16>
    %44 = vector.shape_cast %43 : vector<1x8x8x128xbf16> to vector<8x8x128xbf16>
    %45 = vector.shape_cast %44 : vector<8x8x128xbf16> to vector<64x128xbf16>
    %c6 = arith.constant 6 : index
    %c0_46 = arith.constant 0 : index
    %c0_47 = arith.constant 0 : index
    %46 = vector.load %arg5[%c6, %c0_46, %c0_47] : memref<9x128x128xbf16, #tpu.memory_space<vmem>>, vector<1x128x128xbf16>
    %47 = vector.shape_cast %46 : vector<1x128x128xbf16> to vector<128x128xbf16>
    %cst_48 = arith.constant dense<0.000000e+00> : vector<64x128xf32>
    %48 = tpu.matmul %45, %47, %cst_48 {dimension_numbers = #tpu.dot_dimension_numbers<[1], [0], [0], [1], [0, 0, 1, 1], [], []>} : vector<64x128xbf16>, vector<128x128xbf16>, vector<64x128xf32> -> vector<64x128xf32>
    %49 = arith.addf %42, %48 : vector<64x128xf32>
    %c0_49 = arith.constant 0 : index
    %c1_50 = arith.constant 1 : index
    %c0_51 = arith.constant 0 : index
    %c0_52 = arith.constant 0 : index
    %50 = vector.load %arg2[%c0_49, %c1_50, %c0_51, %c0_52] : memref<1x9x9x128xbf16, #tpu.memory_space<vmem>>, vector<1x8x8x128xbf16>
    %51 = vector.shape_cast %50 : vector<1x8x8x128xbf16> to vector<8x8x128xbf16>
    %52 = vector.shape_cast %51 : vector<8x8x128xbf16> to vector<64x128xbf16>
    %c7 = arith.constant 7 : index
    %c0_53 = arith.constant 0 : index
    %c0_54 = arith.constant 0 : index
    %53 = vector.load %arg5[%c7, %c0_53, %c0_54] : memref<9x128x128xbf16, #tpu.memory_space<vmem>>, vector<1x128x128xbf16>
    %54 = vector.shape_cast %53 : vector<1x128x128xbf16> to vector<128x128xbf16>
    %cst_55 = arith.constant dense<0.000000e+00> : vector<64x128xf32>
    %55 = tpu.matmul %52, %54, %cst_55 {dimension_numbers = #tpu.dot_dimension_numbers<[1], [0], [0], [1], [0, 0, 1, 1], [], []>} : vector<64x128xbf16>, vector<128x128xbf16>, vector<64x128xf32> -> vector<64x128xf32>
    %56 = arith.addf %49, %55 : vector<64x128xf32>
    %c0_56 = arith.constant 0 : index
    %c1_57 = arith.constant 1 : index
    %c1_58 = arith.constant 1 : index
    %c0_59 = arith.constant 0 : index
    %57 = vector.load %arg1[%c0_56, %c1_57, %c1_58, %c0_59] : memref<1x9x9x128xbf16, #tpu.memory_space<vmem>>, vector<1x8x8x128xbf16>
    %58 = vector.shape_cast %57 : vector<1x8x8x128xbf16> to vector<8x8x128xbf16>
    %59 = vector.shape_cast %58 : vector<8x8x128xbf16> to vector<64x128xbf16>
    %c8 = arith.constant 8 : index
    %c0_60 = arith.constant 0 : index
    %c0_61 = arith.constant 0 : index
    %60 = vector.load %arg5[%c8, %c0_60, %c0_61] : memref<9x128x128xbf16, #tpu.memory_space<vmem>>, vector<1x128x128xbf16>
    %61 = vector.shape_cast %60 : vector<1x128x128xbf16> to vector<128x128xbf16>
    %cst_62 = arith.constant dense<0.000000e+00> : vector<64x128xf32>
    %62 = tpu.matmul %59, %61, %cst_62 {dimension_numbers = #tpu.dot_dimension_numbers<[1], [0], [0], [1], [0, 0, 1, 1], [], []>} : vector<64x128xbf16>, vector<128x128xbf16>, vector<64x128xf32> -> vector<64x128xf32>
    %63 = arith.addf %56, %62 : vector<64x128xf32>
    %64 = vector.shape_cast %63 : vector<64x128xf32> to vector<8x8x128xf32>
    %c0_63 = arith.constant 0 : index
    %c0_64 = arith.constant 0 : index
    %c0_65 = arith.constant 0 : index
    %c0_66 = arith.constant 0 : index
    %65 = vector.load %arg7[%c0_63, %c0_64, %c0_65, %c0_66] : memref<1x8x8x128xf32, #tpu.memory_space<vmem>>, vector<1x8x8x128xf32>
    %66 = vector.shape_cast %65 : vector<1x8x8x128xf32> to vector<8x8x128xf32>
    %67 = vector.shape_cast %64 : vector<8x8x128xf32> to vector<1x8x8x128xf32>
    tpu.vector_store %arg7[%c0_63, %c0_64, %c0_65, %c0_66], %67 {strides = array<i32>} : memref<1x8x8x128xf32, #tpu.memory_space<vmem>>, vector<1x8x8x128xf32>,
    %cst_67 = arith.constant dense<0.000000e+00> : vector<128xf32>
    %68 = vector.multi_reduction <add>, %63, %cst_67 [0] : vector<64x128xf32> to vector<128xf32>
    %69 = vector.shape_cast %68 : vector<128xf32> to vector<1x128xf32>
    %c0_68 = arith.constant 0 : index
    %c0_69 = arith.constant 0 : index
    %c0_70 = arith.constant 0 : index
    %70 = vector.load %arg8[%c0_68, %c0_69, %c0_70] : memref<1x2x128xf32, #tpu.memory_space<vmem>>, vector<1x1x128xf32>
    %71 = vector.shape_cast %70 : vector<1x1x128xf32> to vector<1x128xf32>
    %72 = vector.shape_cast %69 : vector<1x128xf32> to vector<1x1x128xf32>
    tpu.vector_store %arg8[%c0_68, %c0_69, %c0_70], %72 {strides = array<i32>} : memref<1x2x128xf32, #tpu.memory_space<vmem>>, vector<1x1x128xf32>,
    %73 = arith.mulf %63, %63 : vector<64x128xf32>
    %cst_71 = arith.constant dense<0.000000e+00> : vector<128xf32>
    %74 = vector.multi_reduction <add>, %73, %cst_71 [0] : vector<64x128xf32> to vector<128xf32>
    %75 = vector.shape_cast %74 : vector<128xf32> to vector<1x128xf32>
    %c0_72 = arith.constant 0 : index
    %c1_73 = arith.constant 1 : index
    %c0_74 = arith.constant 0 : index
    %76 = vector.load %arg8[%c0_72, %c1_73, %c0_74] : memref<1x2x128xf32, #tpu.memory_space<vmem>>, vector<1x1x128xf32>
    %77 = vector.shape_cast %76 : vector<1x1x128xf32> to vector<1x128xf32>
    %78 = vector.shape_cast %75 : vector<1x128xf32> to vector<1x1x128xf32>
    tpu.vector_store %arg8[%c0_72, %c1_73, %c0_74], %78 {strides = array<i32>} : memref<1x2x128xf32, #tpu.memory_space<vmem>>, vector<1x1x128xf32>,
    %c0_75 = arith.constant 0 : index
    %c0_76 = arith.constant 0 : index
    %c0_77 = arith.constant 0 : index
    %c0_78 = arith.constant 0 : index
    %79 = vector.load %arg4[%c0_75, %c0_76, %c0_77, %c0_78] : memref<1x9x9x128xbf16, #tpu.memory_space<vmem>>, vector<1x8x8x128xbf16>
    %80 = vector.shape_cast %79 : vector<1x8x8x128xbf16> to vector<8x8x128xbf16>
    %81 = vector.shape_cast %80 : vector<8x8x128xbf16> to vector<64x128xbf16>
    %c0_79 = arith.constant 0 : index
    %c0_80 = arith.constant 0 : index
    %82 = vector.load %arg6[%c0_79, %c0_80] : memref<128x128xbf16, #tpu.memory_space<vmem>>, vector<128x128xbf16>
    %cst_81 = arith.constant dense<0.000000e+00> : vector<64x128xf32>
    %83 = tpu.matmul %81, %82, %cst_81 {dimension_numbers = #tpu.dot_dimension_numbers<[1], [0], [0], [1], [0, 0, 1, 1], [], []>} : vector<64x128xbf16>, vector<128x128xbf16>, vector<64x128xf32> -> vector<64x128xf32>
    %84 = vector.shape_cast %83 : vector<64x128xf32> to vector<8x8x128xf32>
    %c0_82 = arith.constant 0 : index
    %c0_83 = arith.constant 0 : index
    %c0_84 = arith.constant 0 : index
    %c0_85 = arith.constant 0 : index
    %85 = vector.load %arg9[%c0_82, %c0_83, %c0_84, %c0_85] : memref<1x8x8x128xf32, #tpu.memory_space<vmem>>, vector<1x8x8x128xf32>
    %86 = vector.shape_cast %85 : vector<1x8x8x128xf32> to vector<8x8x128xf32>
    %87 = vector.shape_cast %84 : vector<8x8x128xf32> to vector<1x8x8x128xf32>
    tpu.vector_store %arg9[%c0_82, %c0_83, %c0_84, %c0_85], %87 {strides = array<i32>} : memref<1x8x8x128xf32, #tpu.memory_space<vmem>>, vector<1x8x8x128xf32>,
    %cst_86 = arith.constant dense<0.000000e+00> : vector<128xf32>
    %88 = vector.multi_reduction <add>, %83, %cst_86 [0] : vector<64x128xf32> to vector<128xf32>
    %89 = vector.shape_cast %88 : vector<128xf32> to vector<1x128xf32>
    %c0_87 = arith.constant 0 : index
    %c0_88 = arith.constant 0 : index
    %c0_89 = arith.constant 0 : index
    %90 = vector.load %arg10[%c0_87, %c0_88, %c0_89] : memref<1x2x128xf32, #tpu.memory_space<vmem>>, vector<1x1x128xf32>
    %91 = vector.shape_cast %90 : vector<1x1x128xf32> to vector<1x128xf32>
    %92 = vector.shape_cast %89 : vector<1x128xf32> to vector<1x1x128xf32>
    tpu.vector_store %arg10[%c0_87, %c0_88, %c0_89], %92 {strides = array<i32>} : memref<1x2x128xf32, #tpu.memory_space<vmem>>, vector<1x1x128xf32>,
    %93 = arith.mulf %83, %83 : vector<64x128xf32>
    %cst_90 = arith.constant dense<0.000000e+00> : vector<128xf32>
    %94 = vector.multi_reduction <add>, %93, %cst_90 [0] : vector<64x128xf32> to vector<128xf32>
    %95 = vector.shape_cast %94 : vector<128xf32> to vector<1x128xf32>
    %c0_91 = arith.constant 0 : index
    %c1_92 = arith.constant 1 : index
    %c0_93 = arith.constant 0 : index
    %96 = vector.load %arg10[%c0_91, %c1_92, %c0_93] : memref<1x2x128xf32, #tpu.memory_space<vmem>>, vector<1x1x128xf32>
    %97 = vector.shape_cast %96 : vector<1x1x128xf32> to vector<1x128xf32>
    %98 = vector.shape_cast %95 : vector<1x128xf32> to vector<1x1x128xf32>
    tpu.vector_store %arg10[%c0_91, %c1_92, %c0_93], %98 {strides = array<i32>} : memref<1x2x128xf32, #tpu.memory_space<vmem>>, vector<1x1x128xf32>,
    return
  }
  func.func @transform_0(%arg0: i32) -> (i32, i32, i32, i32) {
    %c0_i32 = arith.constant 0 : i32
    %c0_i32_0 = arith.constant 0 : i32
    %c0_i32_1 = arith.constant 0 : i32
    %c0_i32_2 = arith.constant 0 : i32
    return %arg0, %c0_i32, %c0_i32_0, %c0_i32_1 : i32, i32, i32, i32
  }
  func.func @transform_1(%arg0: i32) -> (i32, i32, i32, i32) {
    %c0_i32 = arith.constant 0 : i32
    %c0_i32_0 = arith.constant 0 : i32
    %c0_i32_1 = arith.constant 0 : i32
    %c0_i32_2 = arith.constant 0 : i32
    return %arg0, %c0_i32, %c0_i32_0, %c0_i32_1 : i32, i32, i32, i32
  }
  func.func @transform_2(%arg0: i32) -> (i32, i32, i32, i32) {
    %c0_i32 = arith.constant 0 : i32
    %c0_i32_0 = arith.constant 0 : i32
    %c0_i32_1 = arith.constant 0 : i32
    %c0_i32_2 = arith.constant 0 : i32
    return %arg0, %c0_i32, %c0_i32_0, %c0_i32_1 : i32, i32, i32, i32
  }
  func.func @transform_3(%arg0: i32) -> (i32, i32, i32, i32) {
    %c0_i32 = arith.constant 0 : i32
    %c0_i32_0 = arith.constant 0 : i32
    %c0_i32_1 = arith.constant 0 : i32
    %c0_i32_2 = arith.constant 0 : i32
    return %arg0, %c0_i32, %c0_i32_0, %c0_i32_1 : i32, i32, i32, i32
  }
  func.func @transform_4(%arg0: i32) -> (i32, i32, i32) {
    %c0_i32 = arith.constant 0 : i32
    %c0_i32_0 = arith.constant 0 : i32
    %c0_i32_1 = arith.constant 0 : i32
    %c0_i32_2 = arith.constant 0 : i32
    return %c0_i32, %c0_i32_0, %c0_i32_1 : i32, i32, i32
  }
  func.func @transform_5(%arg0: i32) -> (i32, i32) {
    %c0_i32 = arith.constant 0 : i32
    %c0_i32_0 = arith.constant 0 : i32
    %c0_i32_1 = arith.constant 0 : i32
    return %c0_i32, %c0_i32_0 : i32, i32
  }
  func.func @transform_6(%arg0: i32) -> (i32, i32, i32, i32) {
    %c0_i32 = arith.constant 0 : i32
    %c0_i32_0 = arith.constant 0 : i32
    %c0_i32_1 = arith.constant 0 : i32
    %c0_i32_2 = arith.constant 0 : i32
    return %arg0, %c0_i32, %c0_i32_0, %c0_i32_1 : i32, i32, i32, i32
  }
  func.func @transform_7(%arg0: i32) -> (i32, i32, i32) {
    %c0_i32 = arith.constant 0 : i32
    %c0_i32_0 = arith.constant 0 : i32
    %c0_i32_1 = arith.constant 0 : i32
    return %arg0, %c0_i32, %c0_i32_0 : i32, i32, i32
  }
  func.func @transform_8(%arg0: i32) -> (i32, i32, i32, i32) {
    %c0_i32 = arith.constant 0 : i32
    %c0_i32_0 = arith.constant 0 : i32
    %c0_i32_1 = arith.constant 0 : i32
    %c0_i32_2 = arith.constant 0 : i32
    return %arg0, %c0_i32, %c0_i32_0, %c0_i32_1 : i32, i32, i32, i32
  }
  func.func @transform_9(%arg0: i32) -> (i32, i32, i32) {
    %c0_i32 = arith.constant 0 : i32
    %c0_i32_0 = arith.constant 0 : i32
    %c0_i32_1 = arith.constant 0 : i32
    return %arg0, %c0_i32, %c0_i32_0 : i32, i32, i32
  }
}

</mosaic_0001>

<bundles_post_ra>
// kernel: tpu_custom_call.1
= control target key start
LH: loop header
LB: loop body
LE: loop exit
PB: predicated region body
PF: predicated region fallthrough
CT: control target
= control target key end

     0   :  { %s3835_s0 = inlined_call_operand.vmem [shape: bf16[2,9,9,128], index: 0, kind: input, shape index: {}]   ;;  %s3836_s1 = inlined_call_operand.vmem [shape: bf16[2,9,9,128], index: 1, kind: input, shape index: {}]   ;;  %s3837_s2 = inlined_call_operand.vmem [shape: bf16[2,9,9,128], index: 2, kind: input, shape index: {}]   ;;  %s3838_s3 = inlined_call_operand.vmem [shape: bf16[2,9,9,128], index: 3, kind: input, shape index: {}]   ;;  %s3839_s4 = inlined_call_operand.hbm [shape: bf16[9,128,128], index: 4, kind: input, shape index: {}]   ;;  %s3840_s5 = inlined_call_operand.vmem [shape: bf16[128,128], index: 5, kind: input, shape index: {}]   ;;  %s3841_s6 = inlined_call_operand.hbm [shape: f32[2,8,8,128], index: 6, kind: output, shape index: {0}]   ;;  %s3842_s7 = inlined_call_operand.hbm [shape: f32[2,2,128], index: 7, kind: output, shape index: {1}]   ;;  %s3843_s8 = inlined_call_operand.hbm [shape: f32[2,8,8,128], index: 8, kind: output, shape index: {2}]   ;;  %s3844_s9 = inlined_call_operand.hbm [shape: f32[2,2,128], index: 9, kind: output, shape index: {3}]  }
   0x1   :  { %3851 = sst [smem:[#allocation15_spill]] %s3835_s0 }
   0x2   :  { %3852 = sst [smem:[#allocation16_spill]] %s3836_s1 }
   0x3   :  { %3853 = sst [smem:[#allocation17_spill]] %s3837_s2 }
   0x4   :  { %3854 = sst [smem:[#allocation18_spill]] %s3838_s3 }
   0x5   :  { %3855 = sst [smem:[#allocation19_spill]] %s3839_s4 }
   0x6   :  { %15 = vsyncpa [#allocation3], 0 }
   0x7   :  { %16 = vsyncpa [#allocation4], 0 }
   0x8   :  { %18 = vsyncpa [#allocation4 + $0x1], 0 }
   0x9   :  { %19 = vsyncpa [#allocation7], 0 }
   0xa   :  { %21 = vsyncpa [#allocation7 + $0x1], 0 }
   0xb   :  { %22 = vsyncpa [#allocation10], 0 }
   0xc   :  { %24 = vsyncpa [#allocation10 + $0x1], 0  ;;  %s3392_s30 = smov 0   ;;  %s3394_s10 = smov 0  }
   0xd   :  { %s3396_s11 = smov 0   ;;  %s3398_s12 = smov 0  }
   0xe LB: > { %s3413_s13 = sadd.s32 4294967295, %s3335_s12   ;;  %s3845_s14 = sadd.s32 4294967294, %s3335_s12   ;;  %s3335_s12 = sphi %s3398_s12, %s3874_s12   ;;  %s3331_s11 = sphi %s3396_s11, %s3873_s11   ;;  %s3327_s10 = sphi %s3394_s10, %s3872_s10   ;;  %s3323_s30 = sphi %s3392_s30, %s3871_s30  }
   0xf   : > { %s3417_s15 = sadd.s32 1, %s3335_s12   ;;  %s183_s16 = sadd.s32 1, %s3331_s11 }
  0x10   : > { %s180_s17 = ssub.s32 %s3335_s12, %s3417_s15  ;;  %p193_p0 = scmp.ne.s32.totalorder %s3331_s11, %s3327_s10 }
  0x11   : > { %p181_p1 = scmp.eq.s32.totalorder %s180_s17, 0  ;;  %p194_p2 = scmp.eq.s32.totalorder %s3413_s13, 1 }
  0x12   : > { %p199_p3 = scmp.ne.s32.totalorder %s3327_s10, %s3323_s30  ;;  %p200_p4 = scmp.eq.s32.totalorder %s3845_s14, 1 }
  0x13   : > { %s3430_s18 = scalar_select %p181_p1, %s3331_s11, %s183_s16  }
  0x14   : > { %p3432_p5 = por %p194_p2, %p193_p0  ;;  %p3436_p6 = por %p200_p4, %p199_p3 }
  0x15   : > { %p2462_p7 = scmp.ge.s32.totalorder %s3335_s12, 1  ;;  %p285_p8 = scmp.lt.s32.totalorder %s3335_s12, 3 }
  0x16   : > { %p3107_p9 = scmp.eq.s32.totalorder %s3413_s13, 0  ;;  %s3858_s4 = sld [smem:[#allocation19_spill]] }
  0x17   : > { %p286_p10 = pnand %p2462_p7, %p285_p8  ;;  %s3337_s24 = smov [#allocation2]  }
  0x18   : > { %s298_s25 = sshll.u32 %s3337_s24, 4  ;;  %s3338_s26 = smov 64   ;;  %s299_s25 = int_to_ptr.vmem [resolvable:$true] %s298_s25 }
  0x19   : > { %p3090_p11 = pneg %p286_p10  ;;  %s3339_s27 = smov 4  }
  0x1a   : > { %349 = sbr.rel (%p286_p10) target bundleno = 402 (0x192), region = 44 }
  0x1b   : > { %p3091_p12 = pnand %p3107_p9, %p3090_p11 }
  0x1c   : > { %s296_s23 = sshll.u32 %s3858_s4, 4  ;;  %s297_s23 = int_to_ptr.hbm [resolvable:$true] %s296_s23 }
  0x1d   : > { %3093 = dma.hbm_to_vmem [thread:$0]  (!%p3091_p12), %s297_s23, 9216, %s299_s25, [#allocation3], %s3338_s26, %s3338_s26, %s3339_s27  }
  0x1f   : > { %3306 = dma.done.wait (%p3107_p9), [#allocation3], 9216  }
  0x20   : > { %3308 = vsyncadd (%p3107_p9), [#allocation3], 4294958080  ;;  %v2974_v0 = vld [vmem:[#allocation2 + $0x78] sm:$0xff]  ;;  %v2973_v2 = vld [vmem:[#allocation2 + $0x70] sm:$0xff]  ;;  %p416_p13 = scmp.lt.s32.totalorder %s3413_s13, 1  ;;  %s3859_s1 = sld [smem:[#allocation16_spill]] }
  0x21   : > { %v2962_v1 = vld [vmem:[#allocation2 + $0x38] sm:$0xff]  ;;  %3061 = vmatpush.bf16.msra.mxu2 %v2974_v0  ;;  %v2961_v3 = vld [vmem:[#allocation2 + $0x30] sm:$0xff]  ;;  %557 = vmatpush.bf16.msra.mxu0 %v2974_v0  ;;  %v2972_v4 = vld [vmem:[#allocation2 + $0x68] sm:$0xff]  ;;  %s3860_s0 = sld [smem:[#allocation15_spill]]  ;;  %vm703_vm0 = vsmask.f32 3328 }
  0x22   : > { %658 = vmatpush.bf16.msra.mxu1 %v2962_v1  ;;  %3069 = vmatpush.bf16.msra.mxu3 %v2962_v1  ;;  %v2960_v5 = vld [vmem:[#allocation2 + $0x28] sm:$0xff]  ;;  %v2971_v6 = vld [vmem:[#allocation2 + $0x60] sm:$0xff]  ;;  %v2970_v8 = vld [vmem:[#allocation2 + $0x58] sm:$0xff]  ;;  %s417_s28 = scalar_select %p416_p13, %s3413_s13, 1  ;;  %vm704_vm1 = vsmask.f32 7440 }
  0x23   : > { %v2959_v7 = vld [vmem:[#allocation2 + $0x20] sm:$0xff]  ;;  %v2958_v9 = vld [vmem:[#allocation2 + $0x18] sm:$0xff]  ;;  %v2969_v10 = vld [vmem:[#allocation2 + $0x50] sm:$0xff]  ;;  %s3861_s2 = sld [smem:[#allocation17_spill]]  ;;  %s3846_s23 = sshll.u32 %s3413_s13, 6 }
  0x24   : > { %v2957_v11 = vld [vmem:[#allocation2 + $0x10] sm:$0xff]  ;;  %s3454_s29 = smul.u32 72, %s417_s28  ;;  %v2968_v12 = vld [vmem:[#allocation2 + $0x48] sm:$0xff]  ;;  %v2967_v14 = vld [vmem:[#allocation2 + $0x40] sm:$0xff]  ;;  %s3864_s3 = sld [smem:[#allocation18_spill]] }
  0x25   : > { %3062 = vmatpush.bf16.msra.mxu2 %v2973_v2  ;;  %558 = vmatpush.bf16.msra.mxu0 %v2973_v2  ;;  %v2956_v13 = vld [vmem:[#allocation2 + $0x8] sm:$0xff]  ;;  %v2955_v15 = vld [vmem:[#allocation2] sm:$0xff]  ;;  %v2982_v22 = vld [vmem:[#allocation2 + $0xb8] sm:$0xff]  ;;  %s2206_s28 = scalar_lea.hbm %s3841_s6, %s3846_s23 }
  0x26   : > { %659 = vmatpush.bf16.msra.mxu1 %v2961_v3  ;;  %3070 = vmatpush.bf16.msra.mxu3 %v2961_v3  ;;  %s3460_s21 = scalar_lea.vmem %s3859_s1, %s3454_s29  ;;  %v2994_v23 = vld [vmem:[#allocation2 + $0xf8] sm:$0xff]  ;;  %v2981_v32 = vld [vmem:[#allocation2 + $0xb0] sm:$0xff]  ;;  %v2980_v44 = vld [vmem:[#allocation2 + $0xa8] sm:$0xff] }
  0x27   : > { %s3466_s24 = scalar_lea.vmem %s3860_s0, %s3454_s29  ;;  %v2485_v16 = vld [vmem:[%s3460_s21 + $0x20] sm:$0xf]  ;;  %v2965_v17 = vld [vmem:[%s3460_s21 + $0x24] sm:$0xf0]  ;;  %v3014_v29 = vld [vmem:[#allocation2 + $0x178] sm:$0xff] }
  0x28   : > { %v2525_v18 = vld [vmem:[%s3466_s24] sm:$0xf]  ;;  %v2951_v19 = vld [vmem:[%s3466_s24 + $0x4] sm:$0xf0]  ;;  %v2486_v26 = vor.u32 %v2965_v17, %v2485_v16  ;;  %v3006_v31 = vld [vmem:[#allocation2 + $0x138] sm:$0xff] }
  0x29   : > { %3063 = vmatpush.bf16.msra.mxu2 %v2972_v4  ;;  %559 = vmatpush.bf16.msra.mxu0 %v2972_v4  ;;  %v2533_v20 = vld [vmem:[%s3466_s24 + $0x20] sm:$0xf]  ;;  %v2953_v21 = vld [vmem:[%s3466_s24 + $0x24] sm:$0xf0]  ;;  %v2526_v27 = vor.u32 %v2951_v19, %v2525_v18  ;;  %s3480_s27 = scalar_lea.vmem %s3861_s2, %s3454_s29  ;;  %v2993_v35 = vld [vmem:[#allocation2 + $0xf0] sm:$0xff] }
  0x2a   : > { %660 = vmatpush.bf16.msra.mxu1 %v2960_v5  ;;  %3071 = vmatpush.bf16.msra.mxu3 %v2960_v5  ;;  %v2477_v24 = vld [vmem:[%s3460_s21] sm:$0xf]  ;;  %v2963_v25 = vld [vmem:[%s3460_s21 + $0x4] sm:$0xf0]  ;;  %v2534_v28 = vor.u32 %v2953_v21, %v2533_v20  ;;  %v3013_v38 = vld [vmem:[#allocation2 + $0x170] sm:$0xff]  ;;  %s3523_s17 = scalar_lea.vmem %s3864_s3, %s3454_s29  ;;  %s3847_s29 = sshll.u32 %s3413_s13, 1 }
  0x2b   : > { %v2478_v30 = vor.u32 %v2963_v25, %v2477_v24  ;;  %v687_v33 = vld [vmem:[%s3466_s24] sm:$0xf]  ;;  %v689_v34 = vld [vmem:[%s3466_s24 + $0x8] sm:$0xf]  ;;  %v3005_v43 = vld [vmem:[#allocation2 + $0x130] sm:$0xff]  ;;  %s3727_s14 = scalar_lea.hbm %s3844_s9, %s3847_s29 }
  0x2c   : > { %v1204_v36 = vld [vmem:[%s3480_s27] sm:$0xf]  ;;  %v1206_v37 = vld [vmem:[%s3480_s27 + $0x8] sm:$0xf]  ;;  %v707_v39 = vshrl.u32 %v687_v33, 16  ;;  %v710_v40 = vshll.u32 %v687_v33, 16  ;;  %vm3499_vm2 = vmor %vm703_vm0, %vm704_vm1 }
  0x2d   : > { %3064 = vmatpush.bf16.msra.mxu2 %v2971_v6  ;;  %560 = vmatpush.bf16.msra.mxu0 %v2971_v6  ;;  %v721_v41 = vshrl.u32 %v689_v34, 16  ;;  %v724_v42 = vshll.u32 %v689_v34, 16  ;;  %v1221_v45 = vshrl.u32 %v1204_v36, 16  ;;  %v1224_v46 = vshll.u32 %v1204_v36, 16  ;;  %v2992_v49 = vld [vmem:[#allocation2 + $0xe8] sm:$0xff]  ;;  %v2979_v52 = vld [vmem:[#allocation2 + $0xa0] sm:$0xff] }
  0x2e   : > { %661 = vmatpush.bf16.msra.mxu1 %v2959_v7  ;;  %3072 = vmatpush.bf16.msra.mxu3 %v2959_v7  ;;  %v1235_v47 = vshrl.u32 %v1206_v37, 16  ;;  %v1238_v48 = vshll.u32 %v1206_v37, 16  ;;  %v3012_v50 = vld [vmem:[#allocation2 + $0x168] sm:$0xff]  ;;  %v2991_v53 = vld [vmem:[#allocation2 + $0xe0] sm:$0xff]  ;;  %v709_v55 = vrot.slane %v707_v39, 4  ;;  %v712_v56 = vrot.slane %v710_v40, 5 }
  0x2f   : > { %v3004_v51 = vld [vmem:[#allocation2 + $0x128] sm:$0xff]  ;;  %v688_v54 = vld [vmem:[%s3466_s24 + $0x4] sm:$0x1]  ;;  %v723_v57 = vrot.slane %v721_v41, 4  ;;  %v726_v58 = vrot.slane %v724_v42, 5  ;;  %v1223_v63 = vrot.slane %v1221_v45, 4 }
  0x30   : > { %v3011_v59 = vld [vmem:[#allocation2 + $0x160] sm:$0xff]  ;;  %v2489_v60 = vld [vmem:[%s3460_s21 + $0x30] sm:$0xf]  ;;  %v2966_v61 = vld [vmem:[%s3460_s21 + $0x34] sm:$0xf0]  ;;  %v1226_v0 = vrot.slane %v1224_v46, 5 }
  0x31   : > { %3065 = vmatpush.bf16.msra.mxu2 %v2970_v8  ;;  %561 = vmatpush.bf16.msra.mxu0 %v2970_v8  ;;  %v690_v62 = vld [vmem:[%s3466_s24 + $0xc] sm:$0x1]  ;;  %v1237_v1 = vrot.slane %v1235_v47, 4  ;;  %v1240_v2 = vrot.slane %v1238_v48, 5  ;;  %v2529_v3 = vld [vmem:[%s3466_s24 + $0x10] sm:$0xf]  ;;  %v2490_v21 = vor.u32 %v2966_v61, %v2489_v60 }
  0x32   : > { %662 = vmatpush.bf16.msra.mxu1 %v2958_v9  ;;  %3073 = vmatpush.bf16.msra.mxu3 %v2958_v9  ;;  %v1205_v4 = vld [vmem:[%s3480_s27 + $0x4] sm:$0x1]  ;;  %v1207_v5 = vld [vmem:[%s3480_s27 + $0xc] sm:$0x1]  ;;  %v2952_v6 = vld [vmem:[%s3466_s24 + $0x14] sm:$0xf0]  ;;  %v1227_v17 = vor.u32 %v1226_v0, %v1223_v63 }
  0x33   : > { %v2537_v7 = vld [vmem:[%s3466_s24 + $0x30] sm:$0xf]  ;;  %v2954_v8 = vld [vmem:[%s3466_s24 + $0x34] sm:$0xf0]  ;;  %v1230_v18 = vshll.u32 %v1205_v4, 16  ;;  %v1241_v19 = vor.u32 %v1240_v2, %v1237_v1  ;;  %v1244_v20 = vshll.u32 %v1207_v5, 16 }
  0x34   : > { %v2481_v9 = vld [vmem:[%s3460_s21 + $0x10] sm:$0xf]  ;;  %v2978_v16 = vld [vmem:[#allocation2 + $0x98] sm:$0xff]  ;;  %v1228_v34 = vrot.slane %v1227_v17, 4  ;;  %v2976_v46 = vld [vmem:[#allocation2 + $0x88] sm:$0xff]  ;;  %s2257_s0 = sshll.u32 %s3727_s14, 4  ;;  %s2258_s0 = int_to_ptr.hbm [resolvable:$true] %s2257_s0 }
  0x35   : > { %3066 = vmatpush.bf16.msra.mxu2 %v2969_v10  ;;  %562 = vmatpush.bf16.msra.mxu0 %v2969_v10  ;;  %v2964_v10 = vld [vmem:[%s3460_s21 + $0x14] sm:$0xf0]  ;;  %v1242_v36 = vrot.slane %v1241_v19, 4  ;;  %v1246_v37 = vrot.slane %v1244_v20, 5  ;;  %v691_v39 = vld [vmem:[%s3466_s24 + $0x10] sm:$0xf] }
  0x36   : > { %663 = vmatpush.bf16.msra.mxu1 %v2957_v11  ;;  %3074 = vmatpush.bf16.msra.mxu3 %v2957_v11  ;;  %v713_v11 = vor.u32 %v712_v56, %v709_v55  ;;  %v3010_v24 = vld [vmem:[#allocation2 + $0x158] sm:$0xff]  ;;  %v2482_v25 = vor.u32 %v2964_v10, %v2481_v9  ;;  %v2989_v41 = vld [vmem:[#allocation2 + $0xd0] sm:$0xff]  ;;  %v3008_v55 = vld [vmem:[#allocation2 + $0x148] sm:$0xff] }
  0x37   : > { %v693_v40 = vld [vmem:[%s3466_s24 + $0x18] sm:$0xf]  ;;  %v3001_v45 = vld [vmem:[#allocation2 + $0x110] sm:$0xff]  ;;  %v3000_v60 = vld [vmem:[#allocation2 + $0x108] sm:$0xff] }
  0x38   : > { %v2975_v61 = vld [vmem:[#allocation2 + $0x80] sm:$0xff]  ;;  %v2983_v2 = vld [vmem:[%s3480_s27 + $0x4] sm:$0xf0]  ;;  %v3026_v5 = vld [vmem:[#allocation2 + $0x1b8] sm:$0xff] }
  0x39   : > { %3067 = vmatpush.bf16.msra.mxu2 %v2968_v12  ;;  %563 = vmatpush.bf16.msra.mxu0 %v2968_v12  ;;  %v716_v12 = vshll.u32 %v688_v54, 16  ;;  %v2988_v54 = vld [vmem:[#allocation2 + $0xc8] sm:$0xff]  ;;  %v3007_v63 = vld [vmem:[#allocation2 + $0x140] sm:$0xff]  ;;  %v3058_v19 = vld [vmem:[%s3840_s5 + $0x38] sm:$0xff] }
  0x3a   : > { %664 = vmatpush.bf16.msra.mxu1 %v2956_v13  ;;  %3075 = vmatpush.bf16.msra.mxu3 %v2956_v13  ;;  %v727_v13 = vor.u32 %v726_v58, %v723_v57  ;;  %v1211_v20 = vld [vmem:[%s3480_s27 + $0x1c] sm:$0x1] }
  0x3d   : > { %3068 = vmatpush.bf16.msra.mxu2 %v2967_v14  ;;  %564 = vmatpush.bf16.msra.mxu0 %v2967_v14  ;;  %v730_v14 = vshll.u32 %v690_v62, 16  ;;  %v3516_v62 = vld [vmem:[%s3480_s27] sm:$0xf] }
  0x3e   : > { %665 = vmatpush.bf16.msra.mxu1 %v2955_v15  ;;  %3076 = vmatpush.bf16.msra.mxu3 %v2955_v15  ;;  %v3003_v15 = vld [vmem:[#allocation2 + $0x120] sm:$0xff] }
  0x40   : > { %575 = vmatmul.bf16.vlgmr.msra.gmra.mxu2 %v2486_v26  ;;  %565 = vmatmul.bf16.vlgmr.msra.gmra.mxu0 %v2478_v30  ;;  %v2990_v26 = vld [vmem:[#allocation2 + $0xd8] sm:$0xff]  ;;  %v732_v30 = vrot.slane %v730_v14, 5 }
  0x41   : > { %899 = vmatpush.bf16.msrb.mxu2 %v2982_v22  ;;  %666 = vmatmul.bf16.vlgmr.msra.gmra.mxu1 %v2526_v27  ;;  %v2530_v22 = vor.u32 %v2952_v6, %v2529_v3  ;;  %v714_v27 = vrot.slane %v713_v11, 4  ;;  %v692_v6 = vld [vmem:[%s3466_s24 + $0x14] sm:$0x1] }
  0x42   : > { %1033 = vmatpush.bf16.msrb.mxu3 %v2994_v23  ;;  %1413 = vmatpush.bf16.msrb.mxu1 %v3014_v29  ;;  %v2538_v23 = vor.u32 %v2954_v8, %v2537_v7  ;;  %v728_v29 = vrot.slane %v727_v13, 4  ;;  %v2987_v7 = vld [vmem:[#allocation2 + $0xc0] sm:$0xff]  ;;  %v694_v8 = vld [vmem:[%s3466_s24 + $0x1c] sm:$0x1]  ;;  %v1209_v13 = vld [vmem:[%s3480_s27 + $0x14] sm:$0x1] }
  0x43   : > { %676 = vmatmul.bf16.vlgmr.msra.gmra.mxu3 %v2534_v28  ;;  %1167 = vmatpush.bf16.msrb.mxu0 %v3006_v31  ;;  %v718_v28 = vrot.slane %v716_v12, 5  ;;  %v3002_v31 = vld [vmem:[#allocation2 + $0x118] sm:$0xff] }
  0x44   : > { %v733_v47 = vsel %vm3499_vm2, %v728_v29, %v732_v30  ;;  %v1258_v30 = vshll.u32 %v1209_v13, 16 }
  0x45   : > { %900 = vmatpush.bf16.msrb.mxu2 %v2981_v32  ;;  %v2977_v32 = vld [vmem:[#allocation2 + $0x90] sm:$0xff]  ;;  %v719_v42 = vsel %vm3499_vm2, %v714_v27, %v718_v28  ;;  %v836_v1 = vunpack.c.l.b16 %v733_v47  ;;  %v1212_v47 = vld [vmem:[%s3480_s27 + $0x20] sm:$0xf] }
  0x46   : > { %1034 = vmatpush.bf16.msrb.mxu3 %v2993_v35  ;;  %1414 = vmatpush.bf16.msrb.mxu1 %v3013_v38  ;;  %v1232_v35 = vrot.slane %v1230_v18, 5  ;;  %v3009_v38 = vld [vmem:[#allocation2 + $0x150] sm:$0xff]  ;;  %v835_v0 = vunpack.c.l.b16 %v719_v42  ;;  %v2653_v18 = vld [vmem:[%s3523_s17] sm:$0xf] }
  0x47   : > { %1168 = vmatpush.bf16.msrb.mxu0 %v3005_v43  ;;  %v1208_v43 = vld [vmem:[%s3480_s27 + $0x10] sm:$0xf] }
  0x48   : > { %v1233_v48 = vsel %vm3499_vm2, %v1228_v34, %v1232_v35  ;;  %v1249_v56 = vshrl.u32 %v1208_v43, 16  ;;  %v1252_v57 = vshll.u32 %v1208_v43, 16  ;;  %v843_v27 = vpack.c.b16 %v836_v1, %v835_v0  ;;  %v695_v43 = vld [vmem:[%s3466_s24 + $0x20] sm:$0xf] }
  0x49   : > { %901 = vmatpush.bf16.msrb.mxu2 %v2980_v44  ;;  %v1210_v44 = vld [vmem:[%s3480_s27 + $0x18] sm:$0xf]  ;;  %v1349_v3 = vunpack.c.l.b16 %v1233_v48  ;;  %v1214_v48 = vld [vmem:[%s3480_s27 + $0x28] sm:$0xf]  ;;  %v3023_v1 = vld [vmem:[#allocation2 + $0x1a0] sm:$0xff] }
  0x4a   : > { %1035 = vmatpush.bf16.msrb.mxu3 %v2992_v49  ;;  %1415 = vmatpush.bf16.msrb.mxu1 %v3012_v50  ;;  %v1247_v49 = vsel %vm3499_vm2, %v1242_v36, %v1246_v37  ;;  %v735_v50 = vshrl.u32 %v691_v39, 16  ;;  %v1263_v58 = vshrl.u32 %v1210_v44, 16  ;;  %v1251_v14 = vrot.slane %v1249_v56, 4 }
  0x4b   : > { %1169 = vmatpush.bf16.msrb.mxu0 %v3004_v51  ;;  %v738_v51 = vshll.u32 %v691_v39, 16  ;;  %v1350_v4 = vunpack.c.l.b16 %v1247_v49  ;;  %v1272_v36 = vshll.u32 %v1211_v20, 16  ;;  %v3046_v39 = vld [vmem:[#allocation2 + $0x238] sm:$0xff]  ;;  %v766_v56 = vshll.u32 %v695_v43, 16 }
  0x4c   : > { %v737_v9 = vrot.slane %v735_v50, 4  ;;  %v1294_v0 = vshll.u32 %v1214_v48, 16 }
  0x4d   : > { %902 = vmatpush.bf16.msrb.mxu2 %v2979_v52  ;;  %v749_v52 = vshrl.u32 %v693_v40, 16  ;;  %v740_v10 = vrot.slane %v738_v51, 5  ;;  %v1357_v28 = vpack.c.b16 %v1350_v4, %v1349_v3 }
  0x4e   : > { %1036 = vmatpush.bf16.msrb.mxu3 %v2991_v53  ;;  %1416 = vmatpush.bf16.msrb.mxu1 %v3011_v59  ;;  %v752_v53 = vshll.u32 %v693_v40, 16  ;;  %v1266_v59 = vshll.u32 %v1210_v44, 16  ;;  %v3057_v40 = vld [vmem:[%s3840_s5 + $0x30] sm:$0xff]  ;;  %v697_v44 = vld [vmem:[%s3466_s24 + $0x28] sm:$0xf] }
  0x4f   : > { %1170 = vmatpush.bf16.msrb.mxu0 %v3003_v15  ;;  %v751_v11 = vrot.slane %v749_v52, 4  ;;  %v1254_v15 = vrot.slane %v1252_v57, 5  ;;  %v741_v29 = vor.u32 %v740_v10, %v737_v9  ;;  %v1274_v52 = vrot.slane %v1272_v36, 5  ;;  %v3044_v9 = vld [vmem:[#allocation2 + $0x228] sm:$0xff] }
  0x50   : > { %580 = vmatmul.bf16.gmra.mxu2 %v2490_v21  ;;  %570 = vmatmul.bf16.gmra.mxu0 %v2482_v25  ;;  %v754_v12 = vrot.slane %v752_v53, 5  ;;  %v1268_v17 = vrot.slane %v1266_v59, 5  ;;  %v2999_v21 = vld [vmem:[#allocation2 + $0x100] sm:$0xff]  ;;  %v744_v25 = vshll.u32 %v692_v6, 16  ;;  %v3024_v53 = vld [vmem:[#allocation2 + $0x1a8] sm:$0xff]  ;;  %v777_v57 = vshrl.u32 %v697_v44, 16 }
  0x51   : > { %903 = vmatpush.bf16.msrb.mxu2 %v2978_v16  ;;  %671 = vmatmul.bf16.gmra.mxu1 %v2530_v22  ;;  %v1265_v16 = vrot.slane %v1263_v58, 4  ;;  %v2606_v22 = vor.u32 %v2983_v2, %v3516_v62  ;;  %v1255_v34 = vor.u32 %v1254_v15, %v1251_v14  ;;  %v780_v58 = vshll.u32 %v697_v44, 16  ;;  %v3036_v59 = vld [vmem:[#allocation2 + $0x1e8] sm:$0xff]  ;;  %v3035_v6 = vld [vmem:[#allocation2 + $0x1e0] sm:$0xff] }
  0x52   : > { %1417 = vmatpush.bf16.msrb.mxu1 %v3010_v24  ;;  %1037 = vmatpush.bf16.msrb.mxu3 %v2990_v26  ;;  %v3038_v24 = vld [vmem:[#allocation2 + $0x1f8] sm:$0xff]  ;;  %v758_v26 = vshll.u32 %v694_v8, 16  ;;  %v1280_v62 = vshll.u32 %v1212_v47, 16  ;;  %v698_v8 = vld [vmem:[%s3466_s24 + $0x2c] sm:$0x1]  ;;  %v3055_v14 = vld [vmem:[%s3840_s5 + $0x20] sm:$0xff] }
  0x53   : > { %681 = vmatmul.bf16.gmra.mxu3 %v2538_v23  ;;  %1171 = vmatpush.bf16.msrb.mxu0 %v3002_v31  ;;  %v2995_v23 = vld [vmem:[%s3523_s17 + $0x4] sm:$0xf0]  ;;  %v3025_v31 = vld [vmem:[#allocation2 + $0x1b0] sm:$0xff]  ;;  %v1269_v35 = vor.u32 %v1268_v17, %v1265_v16  ;;  %v1256_v50 = vrot.slane %v1255_v34, 4  ;;  %v782_v13 = vrot.slane %v780_v58, 5 }
  0x54   : > { %v2654_v37 = vor.u32 %v2995_v23, %v2653_v18  ;;  %v760_v42 = vrot.slane %v758_v26, 5  ;;  %v1213_v15 = vld [vmem:[%s3480_s27 + $0x24] sm:$0x1]  ;;  %v1282_v17 = vrot.slane %v1280_v62, 5  ;;  %v2984_v26 = vld [vmem:[%s3480_s27 + $0x14] sm:$0xf0] }
  0x55   : > { %904 = vmatpush.bf16.msrb.mxu2 %v2977_v32  ;;  %v755_v32 = vor.u32 %v754_v12, %v751_v11  ;;  %v1270_v51 = vrot.slane %v1269_v35, 4  ;;  %v768_v11 = vrot.slane %v766_v56, 5  ;;  %v779_v12 = vrot.slane %v777_v57, 4  ;;  %v3054_v35 = vld [vmem:[%s3840_s5 + $0x18] sm:$0xff]  ;;  %v699_v57 = vld [vmem:[%s3466_s24 + $0x30] sm:$0xf] }
  0x56   : > { %1418 = vmatpush.bf16.msrb.mxu1 %v3009_v38  ;;  %1038 = vmatpush.bf16.msrb.mxu3 %v2989_v41  ;;  %v3037_v38 = vld [vmem:[#allocation2 + $0x1f0] sm:$0xff]  ;;  %v746_v41 = vrot.slane %v744_v25, 5  ;;  %v1215_v25 = vld [vmem:[%s3480_s27 + $0x2c] sm:$0x1]  ;;  %v1286_v34 = vshll.u32 %v1213_v15, 16  ;;  %v3042_v56 = vld [vmem:[#allocation2 + $0x218] sm:$0xff] }
  0x57   : > { %1172 = vmatpush.bf16.msrb.mxu0 %v3001_v45  ;;  %v742_v45 = vrot.slane %v741_v29, 4  ;;  %v756_v49 = vrot.slane %v755_v32, 4  ;;  %v2996_v29 = vld [vmem:[%s3523_s17 + $0x14] sm:$0xf0]  ;;  %v786_v32 = vshll.u32 %v698_v8, 16  ;;  %v783_v36 = vor.u32 %v782_v13, %v779_v12 }
  0x58   : > { %v701_v58 = vld [vmem:[%s3466_s24 + $0x38] sm:$0xf]  ;;  %v2613_v15 = vld [vmem:[%s3480_s27 + $0x20] sm:$0xf] }
  0x59   : > { %905 = vmatpush.bf16.msrb.mxu2 %v2976_v46  ;;  %v1260_v46 = vrot.slane %v1258_v30, 5  ;;  %v747_v2 = vsel %vm3499_vm2, %v742_v45, %v746_v41  ;;  %v761_v3 = vsel %vm3499_vm2, %v756_v49, %v760_v42  ;;  %v3043_v41 = vld [vmem:[#allocation2 + $0x220] sm:$0xff]  ;;  %v788_v49 = vrot.slane %v786_v32, 5  ;;  %v1218_v62 = vld [vmem:[%s3480_s27 + $0x38] sm:$0xf] }
  0x5a   : > { %1419 = vmatpush.bf16.msrb.mxu1 %v3008_v55  ;;  %1039 = vmatpush.bf16.msrb.mxu3 %v2988_v54  ;;  %v3056_v54 = vld [vmem:[%s3840_s5 + $0x28] sm:$0xff]  ;;  %v763_v55 = vshrl.u32 %v695_v43, 16  ;;  %v837_v20 = vunpack.c.l.b16 %v747_v2  ;;  %v808_v8 = vshll.u32 %v701_v58, 16  ;;  %v1319_v12 = vshrl.u32 %v1218_v62, 16 }
  0x5b   : > { %1173 = vmatpush.bf16.msrb.mxu0 %v3000_v60  ;;  %v3045_v60 = vld [vmem:[#allocation2 + $0x230] sm:$0xff]  ;;  %v1261_v4 = vsel %vm3499_vm2, %v1256_v50, %v1260_v46  ;;  %v1288_v50 = vrot.slane %v1286_v34, 5  ;;  %v1322_v13 = vshll.u32 %v1218_v62, 16 }
  0x5c   : > { %v765_v10 = vrot.slane %v763_v55, 4  ;;  %v1351_v23 = vunpack.c.l.b16 %v1261_v4  ;;  %v3021_v46 = vld [vmem:[#allocation2 + $0x190] sm:$0xff]  ;;  %v1321_v34 = vrot.slane %v1319_v12, 4 }
  0x5d   : > { %906 = vmatpush.bf16.msrb.mxu2 %v2975_v61  ;;  %v1277_v61 = vshrl.u32 %v1212_v47, 16  ;;  %v3033_v55 = vld [vmem:[#allocation2 + $0x1d0] sm:$0xff] }
  0x5e   : > { %1420 = vmatpush.bf16.msrb.mxu1 %v3007_v63  ;;  %1040 = vmatpush.bf16.msrb.mxu3 %v2987_v7  ;;  %v1291_v63 = vshrl.u32 %v1214_v48, 16  ;;  %v696_v7 = vld [vmem:[%s3466_s24 + $0x24] sm:$0x1]  ;;  %v769_v30 = vor.u32 %v768_v11, %v765_v10  ;;  %v3041_v4 = vld [vmem:[#allocation2 + $0x210] sm:$0xff] }
  0x5f   : > { %1174 = vmatpush.bf16.msrb.mxu0 %v2999_v21  ;;  %v1279_v16 = vrot.slane %v1277_v61, 4  ;;  %v838_v21 = vunpack.c.l.b16 %v761_v3  ;;  %v1216_v61 = vld [vmem:[%s3480_s27 + $0x30] sm:$0xf]  ;;  %v3032_v3 = vld [vmem:[#allocation2 + $0x1c8] sm:$0xff] }
  0x60   : > { %907 = vmatmul.bf16.vlgmr.msrb.gmra.mxu2 %v843_v27  ;;  %v1293_v18 = vrot.slane %v1291_v63, 4  ;;  %v2657_v27 = vld [vmem:[%s3523_s17 + $0x10] sm:$0xf]  ;;  %v770_v47 = vrot.slane %v769_v30, 4  ;;  %v1305_v10 = vshrl.u32 %v1216_v61, 16  ;;  %v1308_v11 = vshll.u32 %v1216_v61, 16 }
  0x61   : > { %1548 = vmatpush.bf16.msra.mxu2 %v3026_v5  ;;  %1421 = vmatmul.bf16.vlgmr.msrb.gmra.mxu1 %v1357_v28  ;;  %v1275_v5 = vsel %vm3499_vm2, %v1270_v51, %v1274_v52  ;;  %v3022_v28 = vld [vmem:[#allocation2 + $0x198] sm:$0xff]  ;;  %v844_v42 = vpack.c.b16 %v838_v21, %v837_v20  ;;  %v2658_v45 = vor.u32 %v2996_v29, %v2657_v27  ;;  %v784_v51 = vrot.slane %v783_v36, 4  ;;  %v3053_v63 = vld [vmem:[%s3840_s5 + $0x10] sm:$0xff]  ;;  %v3051_v29 = vld [vmem:[%s3840_s5] sm:$0xff] }
  0x62   : > { %2106 = vmatpush.bf16.msra.mxu1 %v3058_v19  ;;  %1683 = vmatpush.bf16.msra.mxu3 %v3038_v24  ;;  %v1296_v19 = vrot.slane %v1294_v0, 5  ;;  %v1352_v24 = vunpack.c.l.b16 %v1275_v5  ;;  %v791_v5 = vshrl.u32 %v699_v57, 16  ;;  %v700_v21 = vld [vmem:[%s3466_s24 + $0x34] sm:$0x1]  ;;  %v1310_v32 = vrot.slane %v1308_v11, 5 }
  0x63   : > { %1041 = vmatmul.bf16.vlgmr.msrb.gmra.mxu3 %v2606_v22  ;;  %1175 = vmatmul.bf16.vlgmr.msrb.gmra.mxu0 %v2654_v37  ;;  %v2609_v22 = vld [vmem:[%s3480_s27 + $0x10] sm:$0xf]  ;;  %v1283_v37 = vor.u32 %v1282_v17, %v1279_v16  ;;  %v789_v0 = vsel %vm3499_vm2, %v784_v51, %v788_v49  ;;  %v2985_v16 = vld [vmem:[%s3480_s27 + $0x24] sm:$0xf0]  ;;  %v1217_v30 = vld [vmem:[%s3480_s27 + $0x34] sm:$0x1] }
  0x64   : > { %1929 = vmatpush.bf16.msra.mxu0 %v3046_v39  ;;  %v1300_v39 = vshll.u32 %v1215_v25, 16  ;;  %v1358_v43 = vpack.c.b16 %v1352_v24, %v1351_v23  ;;  %v2610_v44 = vor.u32 %v2984_v26, %v2609_v22  ;;  %v702_v22 = vld [vmem:[%s3466_s24 + $0x3c] sm:$0x1]  ;;  %v3031_v23 = vld [vmem:[#allocation2 + $0x1c0] sm:$0xff]  ;;  %v3040_v24 = vld [vmem:[#allocation2 + $0x208] sm:$0xff]  ;;  %v793_v25 = vrot.slane %v791_v5, 4 }
  0x65   : > { %1549 = vmatpush.bf16.msra.mxu2 %v3025_v31  ;;  %v772_v31 = vshll.u32 %v696_v7, 16  ;;  %v1284_v52 = vrot.slane %v1283_v37, 4  ;;  %v805_v7 = vshrl.u32 %v701_v58, 16  ;;  %v1219_v36 = vld [vmem:[%s3480_s27 + $0x3c] sm:$0x1] }
  0x66   : > { %2107 = vmatpush.bf16.msra.mxu1 %v3057_v40  ;;  %1684 = vmatpush.bf16.msra.mxu3 %v3037_v38  ;;  %v1297_v38 = vor.u32 %v1296_v19, %v1293_v18  ;;  %v3034_v40 = vld [vmem:[#allocation2 + $0x1d8] sm:$0xff]  ;;  %v840_v18 = vunpack.c.l.b16 %v789_v0  ;;  %v2845_v61 = vld [vmem:[%s3466_s24 + $0x10] sm:$0xf] }
  0x67   : > { %v774_v48 = vrot.slane %v772_v31, 5  ;;  %v807_v27 = vrot.slane %v805_v7, 4  ;;  %v1307_v31 = vrot.slane %v1305_v10, 4  ;;  %v1754_v5 = vshll.u32 %v2845_v61, 16  ;;  %v2617_v10 = vld [vmem:[%s3480_s27 + $0x30] sm:$0xf] }
  0x68   : > { %1930 = vmatpush.bf16.msra.mxu0 %v3045_v60  ;;  %v2986_v11 = vld [vmem:[%s3480_s27 + $0x34] sm:$0xf0]  ;;  %v2665_v12 = vld [vmem:[%s3523_s17 + $0x30] sm:$0xf] }
  0x69   : > { %1550 = vmatpush.bf16.msra.mxu2 %v3024_v53  ;;  %v1298_v53 = vrot.slane %v1297_v38, 4  ;;  %v775_v60 = vsel %vm3499_vm2, %v770_v47, %v774_v48  ;;  %v2614_v38 = vor.u32 %v2985_v16, %v2613_v15  ;;  %v1311_v48 = vor.u32 %v1310_v32, %v1307_v31 }
  0x6a   : > { %2108 = vmatpush.bf16.msra.mxu1 %v3056_v54  ;;  %1685 = vmatpush.bf16.msra.mxu3 %v3036_v59  ;;  %v1302_v54 = vrot.slane %v1300_v39, 5  ;;  %v3020_v59 = vld [vmem:[#allocation2 + $0x188] sm:$0xff]  ;;  %v839_v17 = vunpack.c.l.b16 %v775_v60 }
  0x6b   : > { %v2843_v60 = vld [vmem:[%s3466_s24 + $0x8] sm:$0xf] }
  0x6c   : > { %1931 = vmatpush.bf16.msra.mxu0 %v3044_v9  ;;  %v1303_v2 = vsel %vm3499_vm2, %v1298_v53, %v1302_v54  ;;  %v3052_v9 = vld [vmem:[%s3840_s5 + $0x8] sm:$0xff]  ;;  %v845_v37 = vpack.c.b16 %v840_v18, %v839_v17  ;;  %v1756_v17 = vrot.slane %v1754_v5, 5 }
  0x6d   : > { %1551 = vmatpush.bf16.msra.mxu2 %v3023_v1  ;;  %v1289_v1 = vsel %vm3499_vm2, %v1284_v52, %v1288_v50  ;;  %v1354_v20 = vunpack.c.l.b16 %v1303_v2  ;;  %v1328_v50 = vshll.u32 %v1219_v36, 16  ;;  %v1737_v2 = vshrl.u32 %v2843_v60, 16 }
  0x6e   : > { %2109 = vmatpush.bf16.msra.mxu1 %v3055_v14  ;;  %1686 = vmatpush.bf16.msra.mxu3 %v3035_v6  ;;  %v794_v6 = vshll.u32 %v699_v57, 16  ;;  %v3019_v14 = vld [vmem:[#allocation2 + $0x180] sm:$0xff]  ;;  %v1353_v19 = vunpack.c.l.b16 %v1289_v1  ;;  %v1312_v57 = vrot.slane %v1311_v48, 4 }
  0x70   : > { %1932 = vmatpush.bf16.msra.mxu0 %v3043_v41  ;;  %912 = vmatmul.bf16.gmra.mxu2 %v844_v42  ;;  %v796_v26 = vrot.slane %v794_v6, 5  ;;  %v1359_v39 = vpack.c.b16 %v1354_v20, %v1353_v19  ;;  %v2997_v41 = vld [vmem:[%s3523_s17 + $0x24] sm:$0xf0]  ;;  %v3039_v42 = vld [vmem:[#allocation2 + $0x200] sm:$0xff]  ;;  %v2844_v20 = vld [vmem:[%s3466_s24 + $0xc] sm:$0x1] }
  0x71   : > { %1552 = vmatpush.bf16.msra.mxu2 %v3022_v28  ;;  %1426 = vmatmul.bf16.gmra.mxu1 %v1358_v43  ;;  %v810_v28 = vrot.slane %v808_v8, 5 }
  0x72   : > { %2110 = vmatpush.bf16.msra.mxu1 %v3054_v35  ;;  %1687 = vmatpush.bf16.msra.mxu3 %v3034_v40  ;;  %v1324_v35 = vrot.slane %v1322_v13, 5  ;;  %v2661_v40 = vld [vmem:[%s3523_s17 + $0x20] sm:$0xf]  ;;  %v797_v43 = vor.u32 %v796_v26, %v793_v25  ;;  %v2998_v13 = vld [vmem:[%s3523_s17 + $0x34] sm:$0xf0]  ;;  %v1746_v25 = vshll.u32 %v2844_v20, 16 }
  0x73   : > { %1046 = vmatmul.bf16.gmra.mxu3 %v2610_v44  ;;  %1180 = vmatmul.bf16.gmra.mxu0 %v2658_v45  ;;  %v800_v44 = vshll.u32 %v700_v21, 16  ;;  %v814_v45 = vshll.u32 %v702_v22, 16  ;;  %v811_v47 = vor.u32 %v810_v28, %v807_v27  ;;  %v2662_v51 = vor.u32 %v2997_v41, %v2661_v40  ;;  %v2846_v21 = vld [vmem:[%s3466_s24 + $0x14] sm:$0x1]  ;;  %v2847_v28 = vld [vmem:[%s3466_s24 + $0x18] sm:$0xf] }
  0x74   : > { %1933 = vmatpush.bf16.msra.mxu0 %v3042_v56  ;;  %v1325_v49 = vor.u32 %v1324_v35, %v1321_v34  ;;  %v798_v52 = vrot.slane %v797_v43, 4  ;;  %v2618_v22 = vor.u32 %v2986_v11, %v2617_v10  ;;  %v1760_v27 = vshll.u32 %v2846_v21, 16  ;;  %v3015_v40 = vld [vmem:[%s3466_s24 + $0xc] sm:$0xf0]  ;;  %v2797_v43 = vld [vmem:[%s3460_s21 + $0x8] sm:$0xf] }
  0x75   : > { %1553 = vmatpush.bf16.msra.mxu2 %v3021_v46  ;;  %v1314_v46 = vshll.u32 %v1217_v30, 16  ;;  %v802_v53 = vrot.slane %v800_v44, 5  ;;  %v816_v54 = vrot.slane %v814_v45, 5  ;;  %v812_v56 = vrot.slane %v811_v47, 4  ;;  %v3027_v44 = vld [vmem:[%s3460_s21 + $0xc] sm:$0xf0] }
  0x76   : > { %1688 = vmatpush.bf16.msra.mxu3 %v3033_v55  ;;  %2111 = vmatpush.bf16.msra.mxu1 %v3053_v63  ;;  %v1326_v58 = vrot.slane %v1325_v49, 4  ;;  %v1748_v31 = vrot.slane %v1746_v25, 5  ;;  %v1762_v34 = vrot.slane %v1760_v27, 5  ;;  %v1765_v35 = vshrl.u32 %v2847_v28, 16  ;;  %v2893_v45 = vld [vmem:[%s3523_s17] sm:$0xf] }
  0x77   : > { %v1316_v55 = vrot.slane %v1314_v46, 5  ;;  %v803_v62 = vsel %vm3499_vm2, %v798_v52, %v802_v53  ;;  %v817_v63 = vsel %vm3499_vm2, %v812_v56, %v816_v54  ;;  %v1768_v36 = vshll.u32 %v2847_v28, 16  ;;  %v3047_v46 = vld [vmem:[%s3523_s17 + $0x4] sm:$0xf0]  ;;  %v2848_v53 = vld [vmem:[%s3466_s24 + $0x1c] sm:$0x1] }
  0x78   : > { %1934 = vmatpush.bf16.msra.mxu0 %v3041_v4  ;;  %v1751_v4 = vshrl.u32 %v2845_v61, 16  ;;  %v841_v6 = vunpack.c.l.b16 %v803_v62  ;;  %v842_v7 = vunpack.c.l.b16 %v817_v63  ;;  %v1767_v47 = vrot.slane %v1765_v35, 4  ;;  %v2850_v54 = vld [vmem:[%s3466_s24 + $0x24] sm:$0x1]  ;;  %v2745_v11 = vld [vmem:[%s3466_s24 + $0x18] sm:$0xf] }
  0x79   : > { %1554 = vmatpush.bf16.msra.mxu2 %v3020_v59  ;;  %v1330_v59 = vrot.slane %v1328_v50, 5  ;;  %v1317_v0 = vsel %vm3499_vm2, %v1312_v57, %v1316_v55  ;;  %v1770_v48 = vrot.slane %v1768_v36, 5  ;;  %v2798_v56 = vor.u32 %v3027_v44, %v2797_v43 }
  0x7a   : > { %1689 = vmatpush.bf16.msra.mxu3 %v3032_v3  ;;  %2112 = vmatpush.bf16.msra.mxu1 %v3052_v9  ;;  %v1740_v3 = vshll.u32 %v2843_v60, 16  ;;  %v1355_v8 = vunpack.c.l.b16 %v1317_v0  ;;  %v1753_v16 = vrot.slane %v1751_v4, 4  ;;  %v846_v18 = vpack.c.b16 %v842_v7, %v841_v6  ;;  %v2853_v4 = vld [vmem:[%s3466_s24 + $0x30] sm:$0xf] }
  0x7b   : > { %v1331_v1 = vsel %vm3499_vm2, %v1326_v58, %v1330_v59  ;;  %v2894_v57 = vor.u32 %v3047_v46, %v2893_v45  ;;  %v1771_v58 = vor.u32 %v1770_v48, %v1767_v47  ;;  %v1774_v59 = vshll.u32 %v2848_v53, 16  ;;  %v2749_v46 = vld [vmem:[%s3466_s24 + $0x28] sm:$0xf]  ;;  %v3017_v47 = vld [vmem:[%s3466_s24 + $0x2c] sm:$0xf0] }
  0x7c   : > { %1935 = vmatpush.bf16.msra.mxu0 %v3040_v24  ;;  %v1356_v9 = vunpack.c.l.b16 %v1331_v1  ;;  %v1742_v15 = vrot.slane %v1740_v3, 5  ;;  %v1757_v26 = vor.u32 %v1756_v17, %v1753_v16  ;;  %v1788_v61 = vshll.u32 %v2850_v54, 16  ;;  %v2851_v3 = vld [vmem:[%s3466_s24 + $0x28] sm:$0xf]  ;;  %v2901_v48 = vld [vmem:[%s3523_s17 + $0x20] sm:$0xf] }
  0x7d   : > { %1555 = vmatpush.bf16.msra.mxu2 %v3019_v14  ;;  %v1739_v14 = vrot.slane %v1737_v2, 4  ;;  %v1772_v63 = vrot.slane %v1771_v58, 4  ;;  %v1776_v0 = vrot.slane %v1774_v59, 5  ;;  %v1793_v7 = vshrl.u32 %v2851_v3, 16 }
  0x7e   : > { %1690 = vmatpush.bf16.msra.mxu3 %v3031_v23  ;;  %2113 = vmatpush.bf16.msra.mxu1 %v3051_v29  ;;  %v1360_v19 = vpack.c.b16 %v1356_v9, %v1355_v8  ;;  %v2666_v23 = vor.u32 %v2998_v13, %v2665_v12  ;;  %v2849_v29 = vld [vmem:[%s3466_s24 + $0x20] sm:$0xf]  ;;  %v1758_v32 = vrot.slane %v1757_v26, 4  ;;  %v1790_v2 = vrot.slane %v1788_v61, 5  ;;  %v2801_v13 = vld [vmem:[%s3460_s21 + $0x18] sm:$0xf] }
  0x7f   : > { %v1743_v24 = vor.u32 %v1742_v15, %v1739_v14  ;;  %v1777_v5 = vsel %vm3499_vm2, %v1772_v63, %v1776_v0  ;;  %v1796_v8 = vshll.u32 %v2851_v3, 16  ;;  %v1807_v9 = vshrl.u32 %v2853_v4, 16  ;;  %v3016_v12 = vld [vmem:[%s3466_s24 + $0x1c] sm:$0xf0]  ;;  %v2897_v14 = vld [vmem:[%s3523_s17 + $0x10] sm:$0xf] }
  0x80   : > { %1936 = vmatpush.bf16.msra.mxu0 %v3039_v42  ;;  %917 = vmatmul.bf16.gmra.mxu2 %v845_v37  ;;  %v1779_v37 = vshrl.u32 %v2849_v29, 16  ;;  %v1763_v42 = vsel %vm3499_vm2, %v1758_v32, %v1762_v34  ;;  %v1810_v10 = vshll.u32 %v2853_v4, 16  ;;  %v3048_v15 = vld [vmem:[%s3523_s17 + $0x14] sm:$0xf0]  ;;  %v1867_v16 = vunpack.c.l.b16 %v1777_v5  ;;  %v2858_v61 = vld [vmem:[%s3466_s24 + $0x44] sm:$0x1] }
  0x81   : > { %1431 = vmatmul.bf16.gmra.mxu1 %v1359_v39  ;;  %v1744_v30 = vrot.slane %v1743_v24, 4  ;;  %v2741_v39 = vld [vmem:[%s3466_s24 + $0x8] sm:$0xf]  ;;  %v1866_v52 = vunpack.c.l.b16 %v1763_v42  ;;  %v1798_v20 = vrot.slane %v1796_v8, 5  ;;  %v1809_v21 = vrot.slane %v1807_v9, 4 }
  0x82   : > { %v1781_v49 = vrot.slane %v1779_v37, 4  ;;  %v2742_v55 = vor.u32 %v3015_v40, %v2741_v39  ;;  %v2854_v24 = vld [vmem:[%s3466_s24 + $0x34] sm:$0x1]  ;;  %v2746_v25 = vor.u32 %v3016_v12, %v2745_v11  ;;  %v2898_v26 = vor.u32 %v3048_v15, %v2897_v14  ;;  %v2857_v39 = vld [vmem:[%s3466_s24 + $0x40] sm:$0xf] }
  0x83   : > { %1051 = vmatmul.bf16.gmra.mxu3 %v2614_v38  ;;  %1185 = vmatmul.bf16.gmra.mxu0 %v2662_v51  ;;  %v1782_v38 = vshll.u32 %v2849_v29, 16  ;;  %v1749_v41 = vsel %vm3499_vm2, %v1744_v30, %v1748_v31  ;;  %v1816_v32 = vshll.u32 %v2854_v24, 16  ;;  %v1835_v44 = vshrl.u32 %v2857_v39, 16  ;;  %v3030_v24 = vld [vmem:[%s3460_s21 + $0x3c] sm:$0xf0] }
  0x84   : > { %v1865_v51 = vunpack.c.l.b16 %v1749_v41  ;;  %v1838_v45 = vshll.u32 %v2857_v39, 16  ;;  %v2750_v58 = vor.u32 %v3017_v47, %v2749_v46  ;;  %v1844_v5 = vshll.u32 %v2858_v61, 16 }
  0x85   : > { %v1784_v50 = vrot.slane %v1782_v38, 5  ;;  %v1818_v37 = vrot.slane %v1816_v32, 5  ;;  %v2855_v38 = vld [vmem:[%s3466_s24 + $0x38] sm:$0xf] }
  0x86   : > { %v1873_v62 = vpack.c.b16 %v1866_v52, %v1865_v51  ;;  %v1821_v42 = vshrl.u32 %v2855_v38, 16  ;;  %v1824_v43 = vshll.u32 %v2855_v38, 16  ;;  %v3029_v51 = vld [vmem:[%s3460_s21 + $0x2c] sm:$0xf0]  ;;  %v1846_v11 = vrot.slane %v1844_v5, 5 }
  0x87   : > { %v1785_v60 = vor.u32 %v1784_v50, %v1781_v49  ;;  %v3049_v49 = vld [vmem:[%s3523_s17 + $0x24] sm:$0xf0] }
  0x88   : > { %v2805_v50 = vld [vmem:[%s3460_s21 + $0x28] sm:$0xf]  ;;  %v1823_v54 = vrot.slane %v1821_v42, 4  ;;  %v2902_v59 = vor.u32 %v3049_v49, %v2901_v48 }
  0x89   : > { %v1786_v1 = vrot.slane %v1785_v60, 4  ;;  %v2856_v60 = vld [vmem:[%s3466_s24 + $0x3c] sm:$0x1]  ;;  %v2806_v63 = vor.u32 %v3029_v51, %v2805_v50 }
  0x8a   : > { %v1830_v3 = vshll.u32 %v2856_v60, 16 }
  0x8b   : > { %v1791_v6 = vsel %vm3499_vm2, %v1786_v1, %v1790_v2 }
  0x8c   : > { %v1868_v17 = vunpack.c.l.b16 %v1791_v6  ;;  %v1832_v9 = vrot.slane %v1830_v3, 5 }
  0x8e   : > { %v1874_v28 = vpack.c.b16 %v1868_v17, %v1867_v16 }
  0x90   : > { %922 = vmatmul.bf16.gmra.mxu2 %v846_v18  ;;  %v3028_v18 = vld [vmem:[%s3460_s21 + $0x1c] sm:$0xf0] }
  0x91   : > { %1436 = vmatmul.bf16.gmra.mxu1 %v1360_v19  ;;  %v1795_v19 = vrot.slane %v1793_v7, 4  ;;  %v2802_v27 = vor.u32 %v3028_v18, %v2801_v13 }
  0x93   : > { %1056 = vmatmul.bf16.gmra.mxu3 %v2618_v22  ;;  %1190 = vmatmul.bf16.gmra.mxu0 %v2666_v23  ;;  %v1812_v22 = vrot.slane %v1810_v10, 5  ;;  %v2852_v23 = vld [vmem:[%s3466_s24 + $0x2c] sm:$0x1]  ;;  %v1799_v29 = vor.u32 %v1798_v20, %v1795_v19  ;;  %v2753_v19 = vld [vmem:[%s3466_s24 + $0x38] sm:$0xf] }
  0x94   : > { %v1802_v30 = vshll.u32 %v2852_v23, 16  ;;  %v3018_v20 = vld [vmem:[%s3466_s24 + $0x3c] sm:$0xf0]  ;;  %v2809_v23 = vld [vmem:[%s3460_s21 + $0x38] sm:$0xf]  ;;  %s3678_s21 = sand.u32 1, %s3327_s10  }
  0x95   : > { %v1813_v31 = vor.u32 %v1812_v22, %v1809_v21  ;;  %v1800_v34 = vrot.slane %v1799_v29, 4  ;;  %v2905_v21 = vld [vmem:[%s3523_s17 + $0x30] sm:$0xf]  ;;  %v3050_v22 = vld [vmem:[%s3523_s17 + $0x34] sm:$0xf0]  ;;  %v2754_v29 = vor.u32 %v3018_v20, %v2753_v19  ;;  %s2467_s24 = sshll.u32 %s3678_s21, 6 }
  0x96   : > { %v1804_v35 = vrot.slane %v1802_v30, 5  ;;  %v2906_v30 = vor.u32 %v3050_v22, %v2905_v21  ;;  %s3683_s27 = scalar_lea.vmem [#allocation8], %s2467_s24  ;;  %s3689_s17 = scalar_lea.vmem [#allocation5], %s2467_s24 }
  0x97   : > { %v1814_v36 = vrot.slane %v1813_v31, 4  ;;  %s2207_s16 = sshll.u32 %s3689_s17, 4  ;;  %s3848_s22 = sshll.u32 %s3678_s21, 1  ;;  %s3720_s16 = int_to_ptr.vmem [resolvable:$true] %s2207_s16 }
  0x98   : > { %v1805_v40 = vsel %vm3499_vm2, %v1800_v34, %v1804_v35  ;;  %v2810_v34 = vor.u32 %v3030_v24, %v2809_v23  ;;  %s2209_s24 = sshll.u32 %s2206_s28, 4  ;;  %s3733_s28 = scalar_lea.vmem [#allocation9], %s3848_s22  ;;  %s3729_s24 = int_to_ptr.hbm [resolvable:$true] %s2209_s24 }
  0x99   : > { %v1819_v41 = vsel %vm3499_vm2, %v1814_v36, %v1818_v37  ;;  %v1869_v52 = vunpack.c.l.b16 %v1805_v40  ;;  %s2255_s23 = sshll.u32 %s3733_s28, 4  ;;  %s2180_s25 = scalar_lea.sflag [#allocation4], %s3678_s21  ;;  %s2256_s23 = int_to_ptr.vmem [resolvable:$true] %s2255_s23 }
  0x9a   : > { %v1870_v53 = vunpack.c.l.b16 %v1819_v41  ;;  %s3191_s26 = sshra.s32 %s3729_s24, 4  ;;  %s3197_s22 = scalar_lea.hbm %s3841_s6, 128  ;;  %s3192_s26 = int_to_ptr.hbm [resolvable:$true] %s3191_s26 }
  0x9b   : > { %s3193_s29 = scalar_lea.hbm %s3192_s26, 64  ;;  %p3198_p3 = scmp.lt.s32.totalorder %s3192_s26, %s3841_s6 }
  0x9c   : > { %v1875_v0 = vpack.c.b16 %v1870_v53, %v1869_v52  ;;  %p3194_p0 = scmp.ne.s32.totalorder %s3192_s26, %s3193_s29  ;;  %p3199_p4 = scmp.lt.s32.totalorder %s3197_s22, %s3193_s29 }
  0x9e   : > { %p3195_p1 = pnand %p3194_p0, %p3432_p5  ;;  %p3200_p7 = por %p3199_p4, %p3198_p3 }
  0xa0   : > { %1556 = vmatmul.bf16.vlgmr.msra.gmra.mxu2 %v2742_v55  ;;  %v1826_v55 = vrot.slane %v1824_v43, 5  ;;  %p3196_p2 = pneg %p3195_p1 }
  0xa1   : > { %2114 = vmatmul.bf16.vlgmr.msra.gmra.mxu1 %v2894_v57  ;;  %v1840_v57 = vrot.slane %v1838_v45, 5 }
  0xa2   : > { %v1827_v2 = vor.u32 %v1826_v55, %v1823_v54  ;;  %p3201_p8 = pnand %p3200_p7, %p3196_p2 }
  0xa3   : > { %1691 = vmatmul.bf16.vlgmr.msra.gmra.mxu3 %v2798_v56  ;;  %1937 = vmatmul.bf16.vlgmr.msra.gmra.mxu0 %v1873_v62  ;;  %v1837_v56 = vrot.slane %v1835_v44, 4 }
  0xa4   : > { %v1828_v8 = vrot.slane %v1827_v2, 4 }
  0xa5   : > { %v1841_v4 = vor.u32 %v1840_v57, %v1837_v56 }
  0xa6   : > { %v1833_v16 = vsel %vm3499_vm2, %v1828_v8, %v1832_v9 }
  0xa7   : > { %v1842_v10 = vrot.slane %v1841_v4, 4 }
  0xa9   : > { %v1847_v17 = vsel %vm3499_vm2, %v1842_v10, %v1846_v11 }
  0xb0   : > { %1561 = vmatmul.bf16.gmra.mxu2 %v2746_v25  ;;  %v1871_v25 = vunpack.c.l.b16 %v1833_v16 }
  0xb1   : > { %2119 = vmatmul.bf16.gmra.mxu1 %v2898_v26  ;;  %v1872_v26 = vunpack.c.l.b16 %v1847_v17 }
  0xb3   : > { %1696 = vmatmul.bf16.gmra.mxu3 %v2802_v27  ;;  %1942 = vmatmul.bf16.gmra.mxu0 %v1874_v28  ;;  %v1876_v35 = vpack.c.b16 %v1872_v26, %v1871_v25 }
  0xbd   : > { %v566_v1 = vpop.f32.mrf.mxu0 }
  0xbe   : > { %v667_v62 = vpop.f32.mrf.mxu1 }
  0xbf   : > { %v668_v6 = vadd.f32 %v667_v62, %v566_v1 }
  0xc0   : > { %1566 = vmatmul.bf16.gmra.mxu2 %v2750_v58 }
  0xc1   : > { %2124 = vmatmul.bf16.gmra.mxu1 %v2902_v59 }
  0xc3   : > { %1701 = vmatmul.bf16.gmra.mxu3 %v2806_v63  ;;  %1947 = vmatmul.bf16.gmra.mxu0 %v1875_v0  ;;  %v576_v7 = vpop.f32.mrf.mxu2 }
  0xc5   : > { %v568_v15 = vpop.f32.mrf.mxu0 }
  0xc6   : > { %v677_v12 = vpop.f32.mrf.mxu3  ;;  %v669_v14 = vpop.f32.mrf.mxu1 }
  0xc7   : > { %v3654_v13 = vadd.f32 %v677_v12, %v576_v7  ;;  %v670_v18 = vadd.f32 %v669_v14, %v568_v15 }
  0xcb   : > { %v578_v27 = vpop.f32.mrf.mxu2 }
  0xcd   : > { %v571_v36 = vpop.f32.mrf.mxu0 }
  0xce   : > { %v679_v28 = vpop.f32.mrf.mxu3  ;;  %v672_v32 = vpop.f32.mrf.mxu1 }
  0xcf   : > { %v680_v31 = vadd.f32 %v679_v28, %v578_v27  ;;  %v673_v33 = vadd.f32 %v672_v32, %v571_v36 }
  0xd0   : > { %1571 = vmatmul.bf16.gmra.mxu2 %v2754_v29 }
  0xd1   : > { %2129 = vmatmul.bf16.gmra.mxu1 %v2906_v30 }
  0xd3   : > { %1706 = vmatmul.bf16.gmra.mxu3 %v2810_v34  ;;  %1952 = vmatmul.bf16.gmra.mxu0 %v1876_v35  ;;  %v581_v37 = vpop.f32.mrf.mxu2 }
  0xd5   : > { %v573_v41 = vpop.f32.mrf.mxu0 }
  0xd6   : > { %v682_v38 = vpop.f32.mrf.mxu3  ;;  %v674_v40 = vpop.f32.mrf.mxu1 }
  0xd7   : > { %v683_v39 = vadd.f32 %v682_v38, %v581_v37  ;;  %v675_v42 = vadd.f32 %v674_v40, %v573_v41 }
  0xdb   : > { %v583_v43 = vpop.f32.mrf.mxu2 }
  0xde   : > { %v684_v44 = vpop.f32.mrf.mxu3  ;;  %v1422_v46 = vpop.f32.mrf.mxu1 }
  0xdf   : > { %v685_v45 = vadd.f32 %v684_v44, %v583_v43 }
  0xe0   : > { %v1176_v47 = vpop.f32.mrf.mxu0 }
  0xe3   : > { %v908_v48 = vpop.f32.mrf.mxu2 }
  0xe4   : > { %v928_v49 = vadd.f32 %v908_v48, %v668_v6 }
  0xe6   : > { %v1042_v50 = vpop.f32.mrf.mxu3  ;;  %v1424_v51 = vpop.f32.mrf.mxu1 }
  0xe7   : > { %v1062_v52 = vadd.f32 %v1042_v50, %v928_v49 }
  0xe8   : > { %v1178_v53 = vpop.f32.mrf.mxu0 }
  0xe9   : > { %v1196_v54 = vadd.f32 %v1176_v47, %v1062_v52 }
  0xeb   : > { %v1442_v55 = vadd.f32 %v1422_v46, %v1196_v54  ;;  %v910_v56 = vpop.f32.mrf.mxu2 }
  0xec   : > { %v929_v57 = vadd.f32 %v910_v56, %v670_v18 }
  0xee   : > { %v1044_v58 = vpop.f32.mrf.mxu3  ;;  %v1427_v59 = vpop.f32.mrf.mxu1 }
  0xef   : > { %v1063_v60 = vadd.f32 %v1044_v58, %v929_v57 }
  0xf0   : > { %v1181_v61 = vpop.f32.mrf.mxu0 }
  0xf1   : > { %v1197_v62 = vadd.f32 %v1178_v53, %v1063_v60 }
  0xf3   : > { %v3666_v63 = vadd.f32 %v1424_v51, %v1197_v62  ;;  %v913_v0 = vpop.f32.mrf.mxu2 }
  0xf4   : > { %v930_v1 = vadd.f32 %v913_v0, %v673_v33 }
  0xf6   : > { %v1047_v2 = vpop.f32.mrf.mxu3  ;;  %v1429_v3 = vpop.f32.mrf.mxu1 }
  0xf7   : > { %v1064_v4 = vadd.f32 %v1047_v2, %v930_v1 }
  0xf8   : > { %v1183_v5 = vpop.f32.mrf.mxu0 }
  0xf9   : > { %v1198_v6 = vadd.f32 %v1181_v61, %v1064_v4 }
  0xfb   : > { %v3668_v7 = vadd.f32 %v1427_v59, %v1198_v6  ;;  %v915_v8 = vpop.f32.mrf.mxu2 }
  0xfc   : > { %v931_v9 = vadd.f32 %v915_v8, %v675_v42 }
  0xfe   : > { %v1049_v10 = vpop.f32.mrf.mxu3  ;;  %v1432_v11 = vpop.f32.mrf.mxu1 }
  0xff   : > { %v1065_v12 = vadd.f32 %v1049_v10, %v931_v9 }
 0x100   : > { %v1186_v14 = vpop.f32.mrf.mxu0 }
 0x101   : > { %v1199_v15 = vadd.f32 %v1183_v5, %v1065_v12 }
 0x103   : > { %v3670_v16 = vadd.f32 %v1429_v3, %v1199_v15  ;;  %v918_v17 = vpop.f32.mrf.mxu2 }
 0x104   : > { %v932_v18 = vadd.f32 %v918_v17, %v3654_v13 }
 0x106   : > { %v1052_v19 = vpop.f32.mrf.mxu3  ;;  %v1434_v20 = vpop.f32.mrf.mxu1 }
 0x107   : > { %v1066_v21 = vadd.f32 %v1052_v19, %v932_v18 }
 0x108   : > { %v1188_v22 = vpop.f32.mrf.mxu0 }
 0x109   : > { %v1200_v23 = vadd.f32 %v1186_v14, %v1066_v21 }
 0x10b   : > { %v3673_v24 = vadd.f32 %v1432_v11, %v1200_v23  ;;  %v920_v25 = vpop.f32.mrf.mxu2 }
 0x10c   : > { %v933_v26 = vadd.f32 %v920_v25, %v680_v31 }
 0x10e   : > { %v1054_v27 = vpop.f32.mrf.mxu3  ;;  %v1437_v28 = vpop.f32.mrf.mxu1 }
 0x10f   : > { %v1067_v29 = vadd.f32 %v1054_v27, %v933_v26 }
 0x110   : > { %v1191_v30 = vpop.f32.mrf.mxu0 }
 0x111   : > { %v1201_v32 = vadd.f32 %v1188_v22, %v1067_v29 }
 0x113   : > { %v3675_v34 = vadd.f32 %v1434_v20, %v1201_v32  ;;  %v923_v35 = vpop.f32.mrf.mxu2 }
 0x114   : > { %v934_v36 = vadd.f32 %v923_v35, %v683_v39 }
 0x116   : > { %v1057_v13 = vpop.f32.mrf.mxu3  ;;  %v1439_v33 = vpop.f32.mrf.mxu1 }
 0x117   : > { %v1068_v37 = vadd.f32 %v1057_v13, %v934_v36 }
 0x118   : > { %v1193_v38 = vpop.f32.mrf.mxu0 }
 0x119   : > { %v1202_v40 = vadd.f32 %v1191_v30, %v1068_v37 }
 0x11b   : > { %v3681_v41 = vadd.f32 %v1437_v28, %v1202_v40  ;;  %v925_v31 = vpop.f32.mrf.mxu2 }
 0x11c   : > { %v935_v42 = vadd.f32 %v925_v31, %v685_v45 }
 0x11e   : > { %v1059_v43 = vpop.f32.mrf.mxu3  ;;  %v2115_v44 = vpop.f32.mrf.mxu1 }
 0x11f   : > { %v1069_v46 = vadd.f32 %v1059_v43, %v935_v42  ;;  %2135 = vst [vmem:[%s3683_s27] sm:$0xff] %v2115_v44  ;;  %v2157_v28 = vmul.f32 %v2115_v44, %v2115_v44 }
 0x120   : > { %v1938_v39 = vpop.f32.mrf.mxu0 }
 0x121   : > { %v1203_v47 = vadd.f32 %v1193_v38, %v1069_v46 }
 0x123   : > { %v3686_v48 = vadd.f32 %v1439_v33, %v1203_v47  ;;  %v1557_v49 = vpop.f32.mrf.mxu2 }
 0x124   : > { %v1577_v50 = vadd.f32 %v1557_v49, %v1442_v55 }
 0x126   : > { %v1692_v51 = vpop.f32.mrf.mxu3  ;;  %v2117_v52 = vpop.f32.mrf.mxu1 }
 0x127   : > { %v1712_v53 = vadd.f32 %v1692_v51, %v1577_v50  ;;  %2136 = vst [vmem:[%s3683_s27 + $0x8] sm:$0xff] %v2117_v52  ;;  %v2158_v29 = vmul.f32 %v2117_v52, %v2117_v52  ;;  %v2143_v32 = vadd.f32 %v2117_v52, %v2115_v44 }
 0x128   : > { %v1940_v45 = vpop.f32.mrf.mxu0 }
 0x129   : > { %v1958_v54 = vadd.f32 %v1938_v39, %v1712_v53  ;;  %v2165_v36 = vadd.f32 %v2158_v29, %v2157_v28 }
 0x12b   : > { %1966 = vst [vmem:[%s3689_s17] sm:$0xff] %v1958_v54  ;;  %v1559_v56 = vpop.f32.mrf.mxu2  ;;  %v1988_v62 = vmul.f32 %v1958_v54, %v1958_v54 }
 0x12c   : > { %v1578_v57 = vadd.f32 %v1559_v56, %v3666_v63 }
 0x12e   : > { %v1694_v58 = vpop.f32.mrf.mxu3  ;;  %v2120_v59 = vpop.f32.mrf.mxu1 }
 0x12f   : > { %v1713_v60 = vadd.f32 %v1694_v58, %v1578_v57  ;;  %2137 = vst [vmem:[%s3683_s27 + $0x10] sm:$0xff] %v2120_v59  ;;  %v2159_v13 = vmul.f32 %v2120_v59, %v2120_v59  ;;  %v2144_v42 = vadd.f32 %v2143_v32, %v2120_v59 }
 0x130   : > { %v1943_v55 = vpop.f32.mrf.mxu0 }
 0x131   : > { %v1959_v61 = vadd.f32 %v1940_v45, %v1713_v60  ;;  %v2166_v39 = vadd.f32 %v2165_v36, %v2159_v13 }
 0x133   : > { %1967 = vst [vmem:[%s3689_s17 + $0x8] sm:$0xff] %v1959_v61  ;;  %v1974_v0 = vadd.f32 %v1959_v61, %v1958_v54  ;;  %v1989_v1 = vmul.f32 %v1959_v61, %v1959_v61  ;;  %v1562_v2 = vpop.f32.mrf.mxu2 }
 0x134   : > { %v1579_v4 = vadd.f32 %v1562_v2, %v3668_v7 }
 0x135   : > { %v1996_v3 = vadd.f32 %v1989_v1, %v1988_v62 }
 0x136   : > { %v1697_v5 = vpop.f32.mrf.mxu3  ;;  %v2122_v6 = vpop.f32.mrf.mxu1 }
 0x137   : > { %v1714_v63 = vadd.f32 %v1697_v5, %v1579_v4  ;;  %2138 = vst [vmem:[%s3683_s27 + $0x18] sm:$0xff] %v2122_v6  ;;  %v2160_v38 = vmul.f32 %v2122_v6, %v2122_v6  ;;  %v2145_v44 = vadd.f32 %v2144_v42, %v2122_v6 }
 0x138   : > { %v1945_v8 = vpop.f32.mrf.mxu0 }
 0x139   : > { %v1960_v9 = vadd.f32 %v1943_v55, %v1714_v63  ;;  %v2167_v51 = vadd.f32 %v2166_v39, %v2160_v38 }
 0x13b   : > { %1968 = vst [vmem:[%s3689_s17 + $0x10] sm:$0xff] %v1960_v9  ;;  %v1975_v10 = vadd.f32 %v1974_v0, %v1960_v9  ;;  %v1990_v11 = vmul.f32 %v1960_v9, %v1960_v9  ;;  %v1564_v12 = vpop.f32.mrf.mxu2 }
 0x13c   : > { %v1580_v15 = vadd.f32 %v1564_v12, %v3670_v16 }
 0x13d   : > { %v1997_v14 = vadd.f32 %v1996_v3, %v1990_v11 }
 0x13e   : > { %v1699_v17 = vpop.f32.mrf.mxu3  ;;  %v2125_v18 = vpop.f32.mrf.mxu1 }
 0x13f   : > { %v1715_v19 = vadd.f32 %v1699_v17, %v1580_v15  ;;  %2139 = vst [vmem:[%s3683_s27 + $0x20] sm:$0xff] %v2125_v18  ;;  %v2161_v47 = vmul.f32 %v2125_v18, %v2125_v18  ;;  %v2146_v52 = vadd.f32 %v2145_v44, %v2125_v18 }
 0x140   : > { %v1948_v20 = vpop.f32.mrf.mxu0 }
 0x141   : > { %v1961_v7 = vadd.f32 %v1945_v8, %v1715_v19  ;;  %v2168_v54 = vadd.f32 %v2167_v51, %v2161_v47 }
 0x143   : > { %1969 = vst [vmem:[%s3689_s17 + $0x18] sm:$0xff] %v1961_v7  ;;  %v1976_v21 = vadd.f32 %v1975_v10, %v1961_v7  ;;  %v1991_v22 = vmul.f32 %v1961_v7, %v1961_v7  ;;  %v1567_v23 = vpop.f32.mrf.mxu2 }
 0x144   : > { %v1581_v26 = vadd.f32 %v1567_v23, %v3673_v24 }
 0x145   : > { %v1998_v25 = vadd.f32 %v1997_v14, %v1991_v22 }
 0x146   : > { %v1702_v27 = vpop.f32.mrf.mxu3  ;;  %v2127_v30 = vpop.f32.mrf.mxu1 }
 0x147   : > { %v1716_v16 = vadd.f32 %v1702_v27, %v1581_v26  ;;  %2140 = vst [vmem:[%s3683_s27 + $0x28] sm:$0xff] %v2127_v30  ;;  %v2162_v53 = vmul.f32 %v2127_v30, %v2127_v30  ;;  %v2147_v56 = vadd.f32 %v2146_v52, %v2127_v30 }
 0x148   : > { %v1950_v40 = vpop.f32.mrf.mxu0 }
 0x149   : > { %v1962_v35 = vadd.f32 %v1948_v20, %v1716_v16  ;;  %v2169_v60 = vadd.f32 %v2168_v54, %v2162_v53 }
 0x14b   : > { %1970 = vst [vmem:[%s3689_s17 + $0x20] sm:$0xff] %v1962_v35  ;;  %v1977_v33 = vadd.f32 %v1976_v21, %v1962_v35  ;;  %v1992_v37 = vmul.f32 %v1962_v35, %v1962_v35  ;;  %v1569_v31 = vpop.f32.mrf.mxu2 }
 0x14c   : > { %v1582_v43 = vadd.f32 %v1569_v31, %v3675_v34 }
 0x14d   : > { %v1999_v24 = vadd.f32 %v1998_v25, %v1992_v37 }
 0x14e   : > { %v1704_v46 = vpop.f32.mrf.mxu3  ;;  %v2130_v49 = vpop.f32.mrf.mxu1 }
 0x14f   : > { %v1717_v50 = vadd.f32 %v1704_v46, %v1582_v43  ;;  %2141 = vst [vmem:[%s3683_s27 + $0x30] sm:$0xff] %v2130_v49  ;;  %v2163_v59 = vmul.f32 %v2130_v49, %v2130_v49  ;;  %v2148_v61 = vadd.f32 %v2147_v56, %v2130_v49 }
 0x150   : > { %v1953_v1 = vpop.f32.mrf.mxu0 }
 0x151   : > { %v1963_v45 = vadd.f32 %v1950_v40, %v1717_v50  ;;  %v2170_v3 = vadd.f32 %v2169_v60, %v2163_v59 }
 0x153   : > { %1971 = vst [vmem:[%s3689_s17 + $0x28] sm:$0xff] %v1963_v45  ;;  %v1978_v57 = vadd.f32 %v1977_v33, %v1963_v45  ;;  %v1993_v58 = vmul.f32 %v1963_v45, %v1963_v45  ;;  %v1572_v34 = vpop.f32.mrf.mxu2 }
 0x154   : > { %v1583_v62 = vadd.f32 %v1572_v34, %v3681_v41 }
 0x155   : > { %v2000_v55 = vadd.f32 %v1999_v24, %v1993_v58 }
 0x156   : > { %v1707_v0 = vpop.f32.mrf.mxu3  ;;  %v2132_v2 = vpop.f32.mrf.mxu1 }
 0x157   : > { %v1718_v4 = vadd.f32 %v1707_v0, %v1583_v62  ;;  %2142 = vst [vmem:[%s3683_s27 + $0x38] sm:$0xff] %v2132_v2  ;;  %v2149_v5 = vadd.f32 %v2148_v61, %v2132_v2  ;;  %v2164_v6 = vmul.f32 %v2132_v2, %v2132_v2 }
 0x158   : > { %v1955_v23 = vpop.f32.mrf.mxu0 }
 0x159   : > { %v1964_v63 = vadd.f32 %v1953_v1, %v1718_v4  ;;  %v2150_v8 = vrot.slane %v2149_v5, 4  ;;  %v2171_v9 = vadd.f32 %v2170_v3, %v2164_v6 }
 0x15b   : > { %1972 = vst [vmem:[%s3689_s17 + $0x30] sm:$0xff] %v1964_v63  ;;  %v1979_v41 = vadd.f32 %v1978_v57, %v1964_v63  ;;  %v1994_v10 = vmul.f32 %v1964_v63, %v1964_v63  ;;  %v2151_v11 = vadd.f32 %v2150_v8, %v2149_v5  ;;  %v2172_v12 = vrot.slane %v2171_v9, 4  ;;  %v1574_v14 = vpop.f32.mrf.mxu2 }
 0x15c   : > { %v1584_v19 = vadd.f32 %v1574_v14, %v3686_v48 }
 0x15d   : > { %v2001_v15 = vadd.f32 %v2000_v55, %v1994_v10  ;;  %v2152_v17 = vrot.slane %v2151_v11, 2  ;;  %v2173_v18 = vadd.f32 %v2172_v12, %v2171_v9 }
 0x15e   : > { %v1709_v7 = vpop.f32.mrf.mxu3 }
 0x15f   : > { %v2153_v20 = vadd.f32 %v2152_v17, %v2151_v11  ;;  %v2174_v21 = vrot.slane %v2173_v18, 2  ;;  %v1719_v22 = vadd.f32 %v1709_v7, %v1584_v19 }
 0x161   : > { %v2154_v48 = vrot.slane %v2153_v20, 1  ;;  %v2175_v25 = vadd.f32 %v2174_v21, %v2173_v18  ;;  %v1965_v26 = vadd.f32 %v1955_v23, %v1719_v22 }
 0x163   : > { %v2155_v27 = vadd.f32 %v2154_v48, %v2153_v20  ;;  %v2176_v28 = vrot.slane %v2175_v25, 1  ;;  %1973 = vst [vmem:[%s3689_s17 + $0x38] sm:$0xff] %v1965_v26  ;;  %v1980_v29 = vadd.f32 %v1979_v41, %v1965_v26  ;;  %v1995_v30 = vmul.f32 %v1965_v26, %v1965_v26 }
 0x164   : > { %3204 = shalt.err (!%p3201_p8)
}
 0x165   : > { %s3849_s14 = smov 128   ;;  %s3850_s17 = smov 8   ;;  %v2177_v16 = vadd.f32 %v2176_v28, %v2175_v25  ;;  %v1981_v32 = vrot.slane %v1980_v29, 4  ;;  %v2002_v35 = vadd.f32 %v2001_v15, %v1995_v30  ;;  %2156 = vst [vmem:[%s3733_s28] sm:$0x1] %v2155_v27 }
 0x166   : > { %3082 = dma.vmem_to_hbm [thread:$0]  (%p3432_p5), %s3720_s16, 1024, %s3729_s24, %s2180_s25, %s3849_s14, %s3849_s14, %s3850_s17  }
 0x167   : > { %v1982_v36 = vadd.f32 %v1981_v32, %v1980_v29  ;;  %v2003_v13 = vrot.slane %v2002_v35, 4  ;;  %2178 = vst [vmem:[%s3733_s28 + $0x1] sm:$0x1] %v2177_v16  ;;  %s2195_s1 = scalar_lea.sflag [#allocation10], %s3678_s21  ;;  %s3219_s2 = sshra.s32 %s2258_s0, 4  ;;  %s3220_s2 = int_to_ptr.hbm [resolvable:$true] %s3219_s2 }
 0x168   : > { %s3221_s3 = scalar_lea.hbm %s3220_s2, 2  ;;  %s3225_s16 = scalar_lea.hbm %s3844_s9, 4 }
 0x169   : > { %p3222_p9 = scmp.ne.s32.totalorder %s3220_s2, %s3221_s3  ;;  %p3226_p12 = scmp.lt.s32.totalorder %s3220_s2, %s3844_s9 }
 0x16a   : > { %p3227_p13 = scmp.lt.s32.totalorder %s3225_s16, %s3221_s3 }
 0x16b   : > { %p3223_p10 = pnand %p3222_p9, %p3432_p5 }
 0x16c   : > { %p3228_p0 = por %p3227_p13, %p3226_p12 }
 0x16d   : > { %p3224_p11 = pneg %p3223_p10 }
 0x16f   : > { %p3229_p1 = pnand %p3228_p0, %p3224_p11 }
 0x171   : > { %3232 = shalt.err (!%p3229_p1)
}
 0x172   : > { %3085 = dma.vmem_to_hbm [thread:$0]  (%p3432_p5), %s2256_s23, 32, %s2258_s0, %s2195_s1   ;;  %v1983_v33 = vrot.slane %v1982_v36, 2  ;;  %v2004_v37 = vadd.f32 %v2003_v13, %v2002_v35 }
 0x173   : > { %s3865_s28 = sshll.u32 %s3413_s13, 1  ;;  %s3866_s3 = sshll.u32 %s3413_s13, 6 }
 0x174   : > { %v1984_v38 = vadd.f32 %v1983_v33, %v1982_v36  ;;  %v2005_v40 = vrot.slane %v2004_v37, 2  ;;  %s2222_s2 = scalar_lea.hbm %s3842_s7, %s3865_s28  ;;  %s2237_s16 = scalar_lea.hbm %s3843_s8, %s3866_s3 }
 0x175   : > { %s2184_s22 = sand.u32 1, %s3413_s13   ;;  %s3867_s24 = sshll.u32 %s3678_s21, 1 }
 0x176   : > { %v1985_v31 = vrot.slane %v1984_v38, 1  ;;  %v2006_v42 = vadd.f32 %v2005_v40, %v2004_v37  ;;  %s401_s14 = scalar_lea.vmem [#allocation6], %s3867_s24  ;;  %s2226_s23 = sshll.u32 %s2222_s2, 4  ;;  %s2227_s23 = int_to_ptr.hbm [resolvable:$true] %s2226_s23 }
 0x177   : > { %s2224_s0 = sshll.u32 %s401_s14, 4  ;;  %s2238_s1 = sshll.u32 %s3683_s27, 4  ;;  %s2225_s0 = int_to_ptr.vmem [resolvable:$true] %s2224_s0  ;;  %s3782_s1 = int_to_ptr.vmem [resolvable:$true] %s2238_s1 }
 0x178   : > { %v1986_v24 = vadd.f32 %v1985_v31, %v1984_v38  ;;  %v2007_v43 = vrot.slane %v2006_v42, 1  ;;  %s2240_s17 = sshll.u32 %s2237_s16, 4  ;;  %s3786_s28 = scalar_lea.sflag [#allocation7], %s2184_s22  ;;  %s3784_s17 = int_to_ptr.hbm [resolvable:$true] %s2240_s17 }
 0x179   : > { %s3247_s13 = sshra.s32 %s2227_s23, 4  ;;  %s3253_s26 = scalar_lea.hbm %s3842_s7, 4  ;;  %s3248_s13 = int_to_ptr.hbm [resolvable:$true] %s3247_s13 }
 0x17a   : > { %1987 = vst [vmem:[%s401_s14] sm:$0x1] %v1986_v24  ;;  %v2008_v46 = vadd.f32 %v2007_v43, %v2006_v42  ;;  %s3249_s21 = scalar_lea.hbm %s3248_s13, 2  ;;  %p3254_p7 = scmp.lt.s32.totalorder %s3248_s13, %s3842_s7 }
 0x17b   : > { %p3250_p2 = scmp.ne.s32.totalorder %s3248_s13, %s3249_s21  ;;  %p3255_p8 = scmp.lt.s32.totalorder %s3253_s26, %s3249_s21 }
 0x17c   : > { %2009 = vst [vmem:[%s401_s14 + $0x1] sm:$0x1] %v2008_v46 }
 0x17d   : > { %p3251_p3 = pnand %p3250_p2, %p3432_p5  ;;  %p3256_p9 = por %p3255_p8, %p3254_p7 }
 0x17f   : > { %p3252_p4 = pneg %p3251_p3 }
 0x181   : > { %p3257_p10 = pnand %p3256_p9, %p3252_p4 }
 0x183   : > { %3260 = shalt.err (!%p3257_p10)
}
 0x184   : > { %3083 = dma.vmem_to_hbm [thread:$0]  (%p3432_p5), %s2225_s0, 32, %s2227_s23, %s3786_s28  }
 0x185   : > { %s3275_s14 = sshra.s32 %s3784_s17, 4  ;;  %s3281_s22 = scalar_lea.hbm %s3843_s8, 128  ;;  %s3276_s14 = int_to_ptr.hbm [resolvable:$true] %s3275_s14 }
 0x186   : > { %s3277_s4 = scalar_lea.hbm %s3276_s14, 64  ;;  %p3282_p0 = scmp.lt.s32.totalorder %s3276_s14, %s3843_s8 }
 0x187   : > { %p3278_p11 = scmp.ne.s32.totalorder %s3276_s14, %s3277_s4  ;;  %p3283_p1 = scmp.lt.s32.totalorder %s3281_s22, %s3277_s4 }
 0x189   : > { %p3279_p12 = pnand %p3278_p11, %p3432_p5  ;;  %p3284_p2 = por %p3283_p1, %p3282_p0 }
 0x18b   : > { %p3280_p13 = pneg %p3279_p12 }
 0x18d   : > { %p3285_p3 = pnand %p3284_p2, %p3280_p13 }
 0x18f   : > { %3288 = shalt.err (!%p3285_p3)
}
 0x190   : > { %s3868_s0 = smov 8   ;;  %s3869_s23 = smov 128  }
 0x191   : > { %3084 = dma.vmem_to_hbm [thread:$0]  (%p3432_p5), %s3782_s1, 1024, %s3784_s17, %s3786_s28, %s3869_s23, %s3869_s23, %s3868_s0  }
 0x192 PF: > { %p3109_p4 = scmp.ge.s32.totalorder %s3335_s12, 2  ;;  %s2269_s21 = sand.u32 1, %s3323_s30  }
 0x193   : > { %s2270_s27 = scalar_lea.sflag [#allocation4], %s2269_s21 }
 0x194   : > { %p3095_p7 = pnand %p3109_p4, %p3436_p6 }
 0x196   : > { %p3096_p8 = pneg %p3095_p7 }
 0x198   : > { %3310 = dma.done.wait (%p3096_p8), %s2270_s27, 1024  }
 0x199   : > { %3312 = vsyncadd (%p3096_p8), %s2270_s27, 4294966272  ;;  %s3870_s19 = sadd.s32 4294967294, %s3335_s12  }
 0x19a   : > { %s2279_s25 = sand.u32 1, %s3870_s19  }
 0x19b   : > { %s2280_s26 = scalar_lea.sflag [#allocation7], %s2279_s25 }
 0x19c   : > { %3314 = dma.done.wait (%p3096_p8), %s2280_s26, 1056  }
 0x19d   : > { %3316 = vsyncadd (%p3096_p8), %s2280_s26, 4294966240  ;;  %s2300_s2 = scalar_lea.sflag [#allocation10], %s2269_s21 }
 0x19e   : > { %3318 = dma.done.wait (%p3096_p8), %s2300_s2, 32  }
 0x19f   : > { %3320 = vsyncadd (%p3096_p8), %s2300_s2, 4294967264  ;;  %p27_p5 = scmp.ge.s32.totalorder %s3417_s15, 4   ;;  %s3871_s30 = smov %s3327_s10 }
 0x1a0   : > { %s3872_s10 = smov %s3331_s11  ;;  %s3873_s11 = smov %s3430_s18 }
 0x1a1   : > { %s3874_s12 = smov %s3417_s15  ;;  %29 = sbr.rel (!%p27_p5) target bundleno = 14 (0xe), region = 152 }
 0x1a6   :  { %2306 = vsyncpa [#allocation3], 1 }
 0x1a7   :  { %2308 = vsyncpa [#allocation3 + $0x1], 1 }
 0x1a8   :  { %2309 = vsyncpa [#allocation4], 1 }
 0x1a9   :  { %2311 = vsyncpa [#allocation4 + $0x1], 1 }
 0x1aa   :  { %2312 = vsyncpa [#allocation7], 1 }
 0x1ab   :  { %2314 = vsyncpa [#allocation7 + $0x1], 1 }
 0x1ac   :  { %2315 = vsyncpa [#allocation10], 1 }
 0x1ad   :  { %2317 = vsyncpa [#allocation10 + $0x1], 1 }

</bundles_post_ra>
